<compile_context>
chip_gen: v7x
topology: tpu7x:2x2x1
jax: 0.10.0
libtpu: 0.0.40
codegen_flags: <defaults>
</compile_context>

<pallas_src>
import numpy as np
import jax
import jax.numpy as jnp
from jax import lax
from jax.experimental import pallas as pl
from jax.experimental.pallas import tpu as pltpu


# ----------------------------------------------------------------------------
# Host-side constant builders (numpy -> folded at trace time)
# ----------------------------------------------------------------------------
def generate_spatial_batch(featmap_H, featmap_W):
    spatial = np.zeros((1, featmap_H, featmap_W, 8), dtype=np.float32)
    for h in range(featmap_H):
        for w in range(featmap_W):
            xmin = w / featmap_W * 2 - 1
            xmax = (w + 1) / featmap_W * 2 - 1
            xctr = (xmin + xmax) / 2
            ymin = h / featmap_H * 2 - 1
            ymax = (h + 1) / featmap_H * 2 - 1
            yctr = (ymin + ymax) / 2
            spatial[:, h, w, :] = [xmin, ymin, xmax, ymax, xctr, yctr,
                                   1 / featmap_W, 1 / featmap_H]
    return spatial


def _bilinear_matrix(out_size, in_size):
    """1-D interpolation matrix matching F.interpolate(..., 'bilinear',
    align_corners=True) along one axis.  Pure numpy (trace-time constant)."""
    M = np.zeros((out_size, in_size), dtype=np.float32)
    if in_size == 1:
        M[:, 0] = 1.0
        return M
    if out_size == 1:
        M[0, 0] = 1.0
        return M
    coords = np.arange(out_size, dtype=np.float64) * (in_size - 1) / (out_size - 1)
    lo = np.clip(np.floor(coords).astype(np.int64), 0, in_size - 1)
    hi = np.minimum(lo + 1, in_size - 1)
    frac = (coords - lo).astype(np.float32)
    idx = np.arange(out_size)
    M[idx, lo] += 1.0 - frac
    M[idx, hi] += frac
    return M


# ----------------------------------------------------------------------------
# Fused Pallas kernel: per part i (whole batch folded into lanes)
#   key & query 1x1 convs -> per-batch energy -> softmax -> row-sum
#   -> bilinear upsample (MXU dot) -> gating -> 1x1 projection conv
#   -> BN(eval) affine -> ReLU
# ----------------------------------------------------------------------------
def make_part_graph_kernel(n, hw, fast_attention=False):
    def kernel(x_ref, ap_ref, wq_ref, bq_ref, wk_ref, bk_ref,
               p0_ref, a_ref, ut_ref, wproj_ref, sc_ref, sh_ref,
               co_ref, att_ref):
        x = x_ref[...]                              # (c8, n*hw) pooled feat + coords
        ap = ap_ref[0]                              # (1,  n*hw) pooled part attention

        # ---- query 1x1 conv, lane-dense (bf16 MXU operands, f32 accumulate) --
        xq = (x * ap).astype(jnp.bfloat16)
        q = jnp.dot(wq_ref[...].astype(jnp.bfloat16), xq,
                    preferred_element_type=jnp.float32) + bq_ref[...]   # (64, n*hw)

        if not fast_attention:
            # key 1x1 conv (part-invariant; recomputed per step -- tiny, and
            # avoids a cross-core scratch-init hazard under megacore sharding)
            key = jnp.dot(wk_ref[...].astype(jnp.bfloat16), x.astype(jnp.bfloat16),
                          preferred_element_type=jnp.float32) + bk_ref[...]
            k16 = key.astype(jnp.bfloat16)
            q16 = q.astype(jnp.bfloat16)

        # ---- per-batch energy -> softmax -> row-sum -> bilinear upsample ----
        ups = []
        for b in range(n):                          # small static unroll (n=2)
            if fast_attention:
                # attention = row-sum of softmax == 1.0 exactly (identity).
                attn_row = jnp.ones((1, hw), dtype=jnp.float32)
            else:
                kb = k16[:, b * hw:(b + 1) * hw]    # (64, hw)
                qb = q16[:, b * hw:(b + 1) * hw]    # (64, hw)
                # energy^T[j, i] = sum_d key[d, i] * q[d, j]  (== torch bmm(key^T, q)^T)
                et = lax.dot_general(qb, kb, (((0,), (0,)), ((), ())),
                                     preferred_element_type=jnp.float32)  # (hw, hw)
                # softmax over torch's dim=-1 == axis 0 of et; exact division.
                m = jnp.max(et, axis=0, keepdims=True)
                ex = jnp.exp(et - m)
                s = jnp.sum(ex, axis=0, keepdims=True)
                attn_row = jnp.sum(ex / s, axis=0, keepdims=True)          # (1, hw)
            # fused bilinear upsample (align_corners=True): one MXU dot with
            # the precomputed kron(My, Mx)^T operator (resident in VMEM).
            ups.append(jnp.dot(attn_row, ut_ref[...],
                               preferred_element_type=jnp.float32))        # (1, hwf)
        up_all = jnp.concatenate(ups, axis=-1) if n > 1 else ups[0]        # (1, n*hwf)

        # ---- gating + projection + BN(eval) affine + ReLU --------------------
        a = a_ref[0]                                # (1, n*hwf) hu_att (full res)
        att_out = up_all * a * (1.0 - a)            # interp * hu_att * (1 - hu_att)
        gated = (att_out * p0_ref[...]).astype(jnp.bfloat16)               # (c, n*hwf)
        y = jnp.dot(wproj_ref[0].astype(jnp.bfloat16), gated,
                    preferred_element_type=jnp.float32)                    # (hidden, n*hwf)
        y = y * sc_ref[0] + sh_ref[0]               # InPlaceABNSync(act='none'), eval
        co_ref[0] = jnp.maximum(y, 0.0)             # ReLU
        att_ref[0] = att_out

    return kernel


# ----------------------------------------------------------------------------
# Plain-JAX glue
# ----------------------------------------------------------------------------
def dep_context_forward(p_fea, hu_att_list, params, fast_attention=False):
    n, c, h, w = p_fea.shape
    hp, wp = h // 2, w // 2
    hw, hwf = hp * wp, h * w
    parts = len(hu_att_list)
    c8 = c + 8
    hidden = params["proj_w"].shape[1]

    # ---- trace-time constants (numpy) ---------------------------------------
    coord = generate_spatial_batch(hp, wp)[0]                      # (hp, wp, 8)
    coord_cf = np.ascontiguousarray(coord.transpose(2, 0, 1)).reshape(8, hw)
    coord_b = jnp.asarray(np.tile(coord_cf, (1, n)))               # (8, n*hw)
    My = _bilinear_matrix(h, hp)                                   # (h, hp)
    Mx = _bilinear_matrix(w, wp)                                   # (w, wp)
    UT = jnp.asarray(np.kron(My, Mx).T.astype(np.float32))         # (hw, hwf)

    # ---- channels-first, batch folded into the lane dim ---------------------
    p_pool = p_fea.reshape(n, c, hp, 2, wp, 2).max(axis=(3, 5))    # (n, c, hp, wp)
    p_pool_cf = jnp.transpose(p_pool, (1, 0, 2, 3)).reshape(c, n * hw)
    x = jnp.concatenate([p_pool_cf, coord_b], axis=0)              # (c8, n*hw)

    att = jnp.stack(hu_att_list, axis=0)                           # (parts, n, 1, h, w)
    ap = (att.reshape(parts, n, 1, hp, 2, wp, 2).max(axis=(4, 6))
             .reshape(parts, 1, n * hw))                           # pooled part attention
    a_full = att.reshape(parts, 1, n * hwf)                        # full-res attention
    p0 = jnp.transpose(p_fea, (1, 0, 2, 3)).reshape(c, n * hwf)    # (c, n*hwf)

    bq_col = params["bq"].reshape(-1, 1)
    bk_col = params["bk"].reshape(-1, 1)

    kernel = make_part_graph_kernel(n, hw, fast_attention)

    # VMEM bound: softmax temporaries (~3*hw^2 f32) + resident/double-buffered IO.
    vmem_est = 4 * (3 * hw * hw
                    + 2 * (c8 * n * hw + (c + hidden + 3) * n * hwf)
                    + hw * hwf)
    vmem_limit = int(min(max(4 * vmem_est, 32 * 1024 * 1024), 64 * 1024 * 1024))

    co_all, att_all = pl.pallas_call(
        kernel,
        out_shape=(
            jax.ShapeDtypeStruct((parts, hidden, n * hwf), jnp.float32),
            jax.ShapeDtypeStruct((parts, 1, n * hwf), jnp.float32),
        ),
        # 1-D parts grid; batch folded into the block.  On v7x this gives a
        # 2/1 TC split, but the kernel is overhead-bound so lane-density and
        # fewer grid steps win; part-invariant inputs stay VMEM-resident.
        grid=(parts,),
        in_specs=[
            pl.BlockSpec((c8, n * hw), lambda i: (0, 0)),          # x (const, resident)
            pl.BlockSpec((1, 1, n * hw), lambda i: (i, 0, 0)),     # pooled part att
            pl.BlockSpec((64, c8), lambda i: (0, 0)),              # query conv weight
            pl.BlockSpec((64, 1), lambda i: (0, 0)),               # query conv bias
            pl.BlockSpec((64, c8), lambda i: (0, 0)),              # key conv weight
            pl.BlockSpec((64, 1), lambda i: (0, 0)),               # key conv bias
            pl.BlockSpec((c, n * hwf), lambda i: (0, 0)),          # p_fea0 (const, resident)
            pl.BlockSpec((1, 1, n * hwf), lambda i: (i, 0, 0)),    # hu_att
            pl.BlockSpec((hw, hwf), lambda i: (0, 0)),             # bilinear operator
            pl.BlockSpec((1, hidden, c), lambda i: (i, 0, 0)),     # projection weight
            pl.BlockSpec((1, hidden, 1), lambda i: (i, 0, 0)),     # BN scale
            pl.BlockSpec((1, hidden, 1), lambda i: (i, 0, 0)),     # BN shift
        ],
        out_specs=(
            pl.BlockSpec((1, hidden, n * hwf), lambda i: (i, 0, 0)),
            pl.BlockSpec((1, 1, n * hwf), lambda i: (i, 0, 0)),
        ),
        compiler_params=pltpu.CompilerParams(
            dimension_semantics=("parallel",),
            vmem_limit_bytes=vmem_limit),
    )(x, ap, params["wq"], bq_col, params["wk"], bk_col,
      p0, a_full, UT, params["proj_w"], params["proj_scale"], params["proj_shift"])

    # (hidden, n*hwf) -> (n, hidden, h, w): tiny reshapes + transposes in glue
    dep_cont = [jnp.transpose(co_all[i].reshape(hidden, n, h, w), (1, 0, 2, 3))
                for i in range(parts)]
    dep_cont_att = [jnp.transpose(att_all[i].reshape(1, n, h, w), (1, 0, 2, 3))
                    for i in range(parts)]
    return dep_cont, dep_cont_att


# ----------------------------------------------------------------------------
# main
# ----------------------------------------------------------------------------
if __name__ == "__main__":
    n, c, h, w = 2, 32, 16, 16        # in_dim=32
    hidden = 10                       # hidden_dim=10
    parts = 3                         # parts_num
    c8 = c + 8
    eps = 1e-5

    key0 = jax.random.PRNGKey(0)
    ks = jax.random.split(key0, 12)

    p_fea = jax.random.normal(ks[0], (n, c, h, w), dtype=jnp.float32)
    hu_att_list = [jax.nn.sigmoid(jax.random.normal(ks[1 + i], (n, 1, h, w),
                                                    dtype=jnp.float32))
                   for i in range(parts)]

    # conv weights stored as (out, in) to match squeezed 1x1 Conv2d weights
    wq = 0.05 * jax.random.normal(ks[4], (64, c8), dtype=jnp.float32)
    bq = 0.05 * jax.random.normal(ks[5], (64,), dtype=jnp.float32)
    wk = 0.05 * jax.random.normal(ks[6], (64, c8), dtype=jnp.float32)
    bk = 0.05 * jax.random.normal(ks[7], (64,), dtype=jnp.float32)

    kw, kg, kb, km = jax.random.split(ks[8], 4)
    proj_w = 0.05 * jax.random.normal(kw, (parts, hidden, c), dtype=jnp.float32)
    gamma = 1.0 + 0.1 * jax.random.normal(kg, (parts, hidden, 1), dtype=jnp.float32)
    beta = 0.1 * jax.random.normal(kb, (parts, hidden, 1), dtype=jnp.float32)
    rmean = 0.1 * jax.random.normal(km, (parts, hidden, 1), dtype=jnp.float32)
    rvar = jnp.ones((parts, hidden, 1), dtype=jnp.float32)
    # eval-mode InPlaceABNSync(activation='none') fused into scale/shift
    scale = gamma / jnp.sqrt(rvar + eps)
    shift = beta - rmean * scale

    params = dict(wq=wq, bq=bq, wk=wk, bk=bk,
                  proj_w=proj_w, proj_scale=scale, proj_shift=shift)

    fwd = jax.jit(dep_context_forward)
    dep_cont, dep_cont_att = fwd(p_fea, hu_att_list, params)
    jax.block_until_ready(dep_cont)
    jax.block_until_ready(dep_cont_att)

    assert all(x.shape == (n, hidden, h, w) for x in dep_cont)
    assert all(x.shape == (n, 1, h, w) for x in dep_cont_att)
    print("KERNEL_OK")
</pallas_src>

<mosaic_0001>
module attributes {stable_mosaic.version = 11 : i64} {
  func.func @kernel(%arg0: i32, %arg1: memref<40x128xf32, #tpu.memory_space<vmem>>, %arg2: memref<1x1x128xf32, #tpu.memory_space<vmem>>, %arg3: memref<64x40xf32, #tpu.memory_space<vmem>>, %arg4: memref<64x1xf32, #tpu.memory_space<vmem>>, %arg5: memref<64x40xf32, #tpu.memory_space<vmem>>, %arg6: memref<64x1xf32, #tpu.memory_space<vmem>>, %arg7: memref<32x512xf32, #tpu.memory_space<vmem>>, %arg8: memref<1x1x512xf32, #tpu.memory_space<vmem>>, %arg9: memref<64x256xf32, #tpu.memory_space<vmem>>, %arg10: memref<1x10x32xf32, #tpu.memory_space<vmem>>, %arg11: memref<1x10x1xf32, #tpu.memory_space<vmem>>, %arg12: memref<1x10x1xf32, #tpu.memory_space<vmem>>, %arg13: memref<1x10x512xf32, #tpu.memory_space<vmem>>, %arg14: memref<1x1x512xf32, #tpu.memory_space<vmem>>) attributes {dimension_semantics = [#tpu.dimension_semantics<parallel>], iteration_bounds = array<i64: 3>, scalar_prefetch = 0 : i64, scratch_operands = 0 : i64, tpu.core_type = #tpu.core_type<tc>, window_params = [{pipeline_mode = #tpu.pipeline_mode<synchronous>, transform_indices = @transform_0, window_bounds = array<i64: 40, 128>}, {transform_indices = @transform_1, window_bounds = array<i64: 1, 1, 128>}, {pipeline_mode = #tpu.pipeline_mode<synchronous>, transform_indices = @transform_2, window_bounds = array<i64: 64, 40>}, {pipeline_mode = #tpu.pipeline_mode<synchronous>, transform_indices = @transform_3, window_bounds = array<i64: 64, 1>}, {pipeline_mode = #tpu.pipeline_mode<synchronous>, transform_indices = @transform_4, window_bounds = array<i64: 64, 40>}, {pipeline_mode = #tpu.pipeline_mode<synchronous>, transform_indices = @transform_5, window_bounds = array<i64: 64, 1>}, {pipeline_mode = #tpu.pipeline_mode<synchronous>, transform_indices = @transform_6, window_bounds = array<i64: 32, 512>}, {transform_indices = @transform_7, window_bounds = array<i64: 1, 1, 512>}, {pipeline_mode = #tpu.pipeline_mode<synchronous>, transform_indices = @transform_8, window_bounds = array<i64: 64, 256>}, {transform_indices = @transform_9, window_bounds = array<i64: 1, 10, 32>}, {transform_indices = @transform_10, window_bounds = array<i64: 1, 10, 1>}, {transform_indices = @transform_11, window_bounds = array<i64: 1, 10, 1>}, {transform_indices = @transform_12, window_bounds = array<i64: 1, 10, 512>}, {transform_indices = @transform_13, window_bounds = array<i64: 1, 1, 512>}]} {
    %c0 = arith.constant 0 : index
    %c0_0 = arith.constant 0 : index
    %0 = vector.load %arg1[%c0, %c0_0] : memref<40x128xf32, #tpu.memory_space<vmem>>, vector<40x128xf32>
    %c0_1 = arith.constant 0 : index
    %c0_2 = arith.constant 0 : index
    %c0_3 = arith.constant 0 : index
    %1 = vector.load %arg2[%c0_1, %c0_2, %c0_3] : memref<1x1x128xf32, #tpu.memory_space<vmem>>, vector<1x1x128xf32>
    %2 = vector.shape_cast %1 : vector<1x1x128xf32> to vector<1x128xf32>
    %3 = vector.broadcast %2 : vector<1x128xf32> to vector<40x128xf32>
    %4 = arith.mulf %0, %3 : vector<40x128xf32>
    %5 = arith.truncf %4 : vector<40x128xf32> to vector<40x128xbf16>
    %c0_4 = arith.constant 0 : index
    %c0_5 = arith.constant 0 : index
    %6 = vector.load %arg3[%c0_4, %c0_5] : memref<64x40xf32, #tpu.memory_space<vmem>>, vector<64x40xf32>
    %7 = arith.truncf %6 : vector<64x40xf32> to vector<64x40xbf16>
    %cst = arith.constant dense<0.000000e+00> : vector<64x128xf32>
    %8 = tpu.matmul %7, %5, %cst {dimension_numbers = #tpu.dot_dimension_numbers<[1], [0], [0], [1], [0, 0, 1, 1], [], []>} : vector<64x40xbf16>, vector<40x128xbf16>, vector<64x128xf32> -> vector<64x128xf32>
    %c0_6 = arith.constant 0 : index
    %c0_7 = arith.constant 0 : index
    %9 = vector.load %arg4[%c0_6, %c0_7] : memref<64x1xf32, #tpu.memory_space<vmem>>, vector<64x1xf32>
    %10 = vector.broadcast %9 : vector<64x1xf32> to vector<64x128xf32>
    %11 = arith.addf %8, %10 : vector<64x128xf32>
    %c0_8 = arith.constant 0 : index
    %c0_9 = arith.constant 0 : index
    %12 = vector.load %arg5[%c0_8, %c0_9] : memref<64x40xf32, #tpu.memory_space<vmem>>, vector<64x40xf32>
    %13 = arith.truncf %12 : vector<64x40xf32> to vector<64x40xbf16>
    %14 = arith.truncf %0 : vector<40x128xf32> to vector<40x128xbf16>
    %cst_10 = arith.constant dense<0.000000e+00> : vector<64x128xf32>
    %15 = tpu.matmul %13, %14, %cst_10 {dimension_numbers = #tpu.dot_dimension_numbers<[1], [0], [0], [1], [0, 0, 1, 1], [], []>} : vector<64x40xbf16>, vector<40x128xbf16>, vector<64x128xf32> -> vector<64x128xf32>
    %c0_11 = arith.constant 0 : index
    %c0_12 = arith.constant 0 : index
    %16 = vector.load %arg6[%c0_11, %c0_12] : memref<64x1xf32, #tpu.memory_space<vmem>>, vector<64x1xf32>
    %17 = vector.broadcast %16 : vector<64x1xf32> to vector<64x128xf32>
    %18 = arith.addf %15, %17 : vector<64x128xf32>
    %19 = arith.truncf %18 : vector<64x128xf32> to vector<64x128xbf16>
    %20 = arith.truncf %11 : vector<64x128xf32> to vector<64x128xbf16>
    %21 = vector.extract_strided_slice %19 {offsets = [0, 0], sizes = [64, 64], strides = [1, 1]} : vector<64x128xbf16> to vector<64x64xbf16>
    %22 = vector.extract_strided_slice %20 {offsets = [0, 0], sizes = [64, 64], strides = [1, 1]} : vector<64x128xbf16> to vector<64x64xbf16>
    %cst_13 = arith.constant dense<0.000000e+00> : vector<64x64xf32>
    %23 = tpu.matmul %22, %21, %cst_13 {dimension_numbers = #tpu.dot_dimension_numbers<[0], [0], [1], [1], [0, 1, 1, 1], [], []>} : vector<64x64xbf16>, vector<64x64xbf16>, vector<64x64xf32> -> vector<64x64xf32>
    %cst_14 = arith.constant dense<0xFF800000> : vector<64xf32>
    %24 = vector.multi_reduction <maximumf>, %23, %cst_14 [0] : vector<64x64xf32> to vector<64xf32>
    %25 = vector.shape_cast %24 : vector<64xf32> to vector<1x64xf32>
    %26 = vector.broadcast %25 : vector<1x64xf32> to vector<64x64xf32>
    %27 = arith.subf %23, %26 : vector<64x64xf32>
    %28 = math.exp %27 : vector<64x64xf32>
    %cst_15 = arith.constant dense<0.000000e+00> : vector<64xf32>
    %29 = vector.multi_reduction <add>, %28, %cst_15 [0] : vector<64x64xf32> to vector<64xf32>
    %30 = vector.shape_cast %29 : vector<64xf32> to vector<1x64xf32>
    %31 = vector.broadcast %30 : vector<1x64xf32> to vector<64x64xf32>
    %32 = arith.divf %28, %31 : vector<64x64xf32>
    %cst_16 = arith.constant dense<0.000000e+00> : vector<64xf32>
    %33 = vector.multi_reduction <add>, %32, %cst_16 [0] : vector<64x64xf32> to vector<64xf32>
    %34 = vector.shape_cast %33 : vector<64xf32> to vector<1x64xf32>
    %c0_17 = arith.constant 0 : index
    %c0_18 = arith.constant 0 : index
    %35 = vector.load %arg9[%c0_17, %c0_18] : memref<64x256xf32, #tpu.memory_space<vmem>>, vector<64x256xf32>
    %cst_19 = arith.constant dense<0.000000e+00> : vector<1x256xf32>
    %36 = tpu.matmul %34, %35, %cst_19 {dimension_numbers = #tpu.dot_dimension_numbers<[1], [0], [0], [1], [0, 0, 1, 1], [], []>} : vector<1x64xf32>, vector<64x256xf32>, vector<1x256xf32> -> vector<1x256xf32>
    %37 = vector.extract_strided_slice %19 {offsets = [0, 64], sizes = [64, 64], strides = [1, 1]} : vector<64x128xbf16> to vector<64x64xbf16>
    %38 = vector.extract_strided_slice %20 {offsets = [0, 64], sizes = [64, 64], strides = [1, 1]} : vector<64x128xbf16> to vector<64x64xbf16>
    %cst_20 = arith.constant dense<0.000000e+00> : vector<64x64xf32>
    %39 = tpu.matmul %38, %37, %cst_20 {dimension_numbers = #tpu.dot_dimension_numbers<[0], [0], [1], [1], [0, 1, 1, 1], [], []>} : vector<64x64xbf16>, vector<64x64xbf16>, vector<64x64xf32> -> vector<64x64xf32>
    %cst_21 = arith.constant dense<0xFF800000> : vector<64xf32>
    %40 = vector.multi_reduction <maximumf>, %39, %cst_21 [0] : vector<64x64xf32> to vector<64xf32>
    %41 = vector.shape_cast %40 : vector<64xf32> to vector<1x64xf32>
    %42 = vector.broadcast %41 : vector<1x64xf32> to vector<64x64xf32>
    %43 = arith.subf %39, %42 : vector<64x64xf32>
    %44 = math.exp %43 : vector<64x64xf32>
    %cst_22 = arith.constant dense<0.000000e+00> : vector<64xf32>
    %45 = vector.multi_reduction <add>, %44, %cst_22 [0] : vector<64x64xf32> to vector<64xf32>
    %46 = vector.shape_cast %45 : vector<64xf32> to vector<1x64xf32>
    %47 = vector.broadcast %46 : vector<1x64xf32> to vector<64x64xf32>
    %48 = arith.divf %44, %47 : vector<64x64xf32>
    %cst_23 = arith.constant dense<0.000000e+00> : vector<64xf32>
    %49 = vector.multi_reduction <add>, %48, %cst_23 [0] : vector<64x64xf32> to vector<64xf32>
    %50 = vector.shape_cast %49 : vector<64xf32> to vector<1x64xf32>
    %c0_24 = arith.constant 0 : index
    %c0_25 = arith.constant 0 : index
    %51 = vector.load %arg9[%c0_24, %c0_25] : memref<64x256xf32, #tpu.memory_space<vmem>>, vector<64x256xf32>
    %cst_26 = arith.constant dense<0.000000e+00> : vector<1x256xf32>
    %52 = tpu.matmul %50, %51, %cst_26 {dimension_numbers = #tpu.dot_dimension_numbers<[1], [0], [0], [1], [0, 0, 1, 1], [], []>} : vector<1x64xf32>, vector<64x256xf32>, vector<1x256xf32> -> vector<1x256xf32>
    %53 = tpu.concatenate %36, %52 in 1 : vector<1x256xf32>, vector<1x256xf32> -> vector<1x512xf32>
    %c0_27 = arith.constant 0 : index
    %c0_28 = arith.constant 0 : index
    %c0_29 = arith.constant 0 : index
    %54 = vector.load %arg8[%c0_27, %c0_28, %c0_29] : memref<1x1x512xf32, #tpu.memory_space<vmem>>, vector<1x1x512xf32>
    %55 = vector.shape_cast %54 : vector<1x1x512xf32> to vector<1x512xf32>
    %56 = arith.mulf %53, %55 : vector<1x512xf32>
    %cst_30 = arith.constant 1.000000e+00 : f32
    %57 = vector.broadcast %cst_30 : f32 to vector<1x512xf32>
    %58 = arith.subf %57, %55 : vector<1x512xf32>
    %59 = arith.mulf %56, %58 : vector<1x512xf32>
    %c0_31 = arith.constant 0 : index
    %c0_32 = arith.constant 0 : index
    %60 = vector.load %arg7[%c0_31, %c0_32] : memref<32x512xf32, #tpu.memory_space<vmem>>, vector<32x512xf32>
    %61 = vector.broadcast %59 : vector<1x512xf32> to vector<32x512xf32>
    %62 = arith.mulf %61, %60 : vector<32x512xf32>
    %63 = arith.truncf %62 : vector<32x512xf32> to vector<32x512xbf16>
    %c0_33 = arith.constant 0 : index
    %c0_34 = arith.constant 0 : index
    %c0_35 = arith.constant 0 : index
    %64 = vector.load %arg10[%c0_33, %c0_34, %c0_35] : memref<1x10x32xf32, #tpu.memory_space<vmem>>, vector<1x10x32xf32>
    %65 = vector.shape_cast %64 : vector<1x10x32xf32> to vector<10x32xf32>
    %66 = arith.truncf %65 : vector<10x32xf32> to vector<10x32xbf16>
    %cst_36 = arith.constant dense<0.000000e+00> : vector<10x512xf32>
    %67 = tpu.matmul %66, %63, %cst_36 {dimension_numbers = #tpu.dot_dimension_numbers<[1], [0], [0], [1], [0, 0, 1, 1], [], []>} : vector<10x32xbf16>, vector<32x512xbf16>, vector<10x512xf32> -> vector<10x512xf32>
    %c0_37 = arith.constant 0 : index
    %c0_38 = arith.constant 0 : index
    %c0_39 = arith.constant 0 : index
    %68 = vector.load %arg11[%c0_37, %c0_38, %c0_39] : memref<1x10x1xf32, #tpu.memory_space<vmem>>, vector<1x10x1xf32>
    %69 = vector.shape_cast %68 : vector<1x10x1xf32> to vector<10x1xf32>
    %70 = vector.broadcast %69 : vector<10x1xf32> to vector<10x512xf32>
    %71 = arith.mulf %67, %70 : vector<10x512xf32>
    %c0_40 = arith.constant 0 : index
    %c0_41 = arith.constant 0 : index
    %c0_42 = arith.constant 0 : index
    %72 = vector.load %arg12[%c0_40, %c0_41, %c0_42] : memref<1x10x1xf32, #tpu.memory_space<vmem>>, vector<1x10x1xf32>
    %73 = vector.shape_cast %72 : vector<1x10x1xf32> to vector<10x1xf32>
    %74 = vector.broadcast %73 : vector<10x1xf32> to vector<10x512xf32>
    %75 = arith.addf %71, %74 : vector<10x512xf32>
    %cst_43 = arith.constant 0.000000e+00 : f32
    %76 = vector.broadcast %cst_43 : f32 to vector<10x512xf32>
    %77 = arith.maximumf %75, %76 : vector<10x512xf32>
    %c0_44 = arith.constant 0 : index
    %c0_45 = arith.constant 0 : index
    %c0_46 = arith.constant 0 : index
    %78 = vector.load %arg13[%c0_44, %c0_45, %c0_46] : memref<1x10x512xf32, #tpu.memory_space<vmem>>, vector<1x10x512xf32>
    %79 = vector.shape_cast %78 : vector<1x10x512xf32> to vector<10x512xf32>
    %80 = vector.shape_cast %77 : vector<10x512xf32> to vector<1x10x512xf32>
    tpu.vector_store %arg13[%c0_44, %c0_45, %c0_46], %80 {strides = array<i32>} : memref<1x10x512xf32, #tpu.memory_space<vmem>>, vector<1x10x512xf32>,
    %c0_47 = arith.constant 0 : index
    %c0_48 = arith.constant 0 : index
    %c0_49 = arith.constant 0 : index
    %81 = vector.load %arg14[%c0_47, %c0_48, %c0_49] : memref<1x1x512xf32, #tpu.memory_space<vmem>>, vector<1x1x512xf32>
    %82 = vector.shape_cast %81 : vector<1x1x512xf32> to vector<1x512xf32>
    %83 = vector.shape_cast %59 : vector<1x512xf32> to vector<1x1x512xf32>
    tpu.vector_store %arg14[%c0_47, %c0_48, %c0_49], %83 {strides = array<i32>} : memref<1x1x512xf32, #tpu.memory_space<vmem>>, vector<1x1x512xf32>,
    return
  }
  func.func @transform_0(%arg0: i32) -> (i32, i32) {
    %c0_i32 = arith.constant 0 : i32
    %c0_i32_0 = arith.constant 0 : i32
    %c0_i32_1 = arith.constant 0 : i32
    return %c0_i32, %c0_i32_0 : i32, i32
  }
  func.func @transform_1(%arg0: i32) -> (i32, i32, i32) {
    %c0_i32 = arith.constant 0 : i32
    %c0_i32_0 = arith.constant 0 : i32
    %c0_i32_1 = arith.constant 0 : i32
    return %arg0, %c0_i32, %c0_i32_0 : i32, i32, i32
  }
  func.func @transform_2(%arg0: i32) -> (i32, i32) {
    %c0_i32 = arith.constant 0 : i32
    %c0_i32_0 = arith.constant 0 : i32
    %c0_i32_1 = arith.constant 0 : i32
    return %c0_i32, %c0_i32_0 : i32, i32
  }
  func.func @transform_3(%arg0: i32) -> (i32, i32) {
    %c0_i32 = arith.constant 0 : i32
    %c0_i32_0 = arith.constant 0 : i32
    %c0_i32_1 = arith.constant 0 : i32
    return %c0_i32, %c0_i32_0 : i32, i32
  }
  func.func @transform_4(%arg0: i32) -> (i32, i32) {
    %c0_i32 = arith.constant 0 : i32
    %c0_i32_0 = arith.constant 0 : i32
    %c0_i32_1 = arith.constant 0 : i32
    return %c0_i32, %c0_i32_0 : i32, i32
  }
  func.func @transform_5(%arg0: i32) -> (i32, i32) {
    %c0_i32 = arith.constant 0 : i32
    %c0_i32_0 = arith.constant 0 : i32
    %c0_i32_1 = arith.constant 0 : i32
    return %c0_i32, %c0_i32_0 : i32, i32
  }
  func.func @transform_6(%arg0: i32) -> (i32, i32) {
    %c0_i32 = arith.constant 0 : i32
    %c0_i32_0 = arith.constant 0 : i32
    %c0_i32_1 = arith.constant 0 : i32
    return %c0_i32, %c0_i32_0 : i32, i32
  }
  func.func @transform_7(%arg0: i32) -> (i32, i32, i32) {
    %c0_i32 = arith.constant 0 : i32
    %c0_i32_0 = arith.constant 0 : i32
    %c0_i32_1 = arith.constant 0 : i32
    return %arg0, %c0_i32, %c0_i32_0 : i32, i32, i32
  }
  func.func @transform_8(%arg0: i32) -> (i32, i32) {
    %c0_i32 = arith.constant 0 : i32
    %c0_i32_0 = arith.constant 0 : i32
    %c0_i32_1 = arith.constant 0 : i32
    return %c0_i32, %c0_i32_0 : i32, i32
  }
  func.func @transform_9(%arg0: i32) -> (i32, i32, i32) {
    %c0_i32 = arith.constant 0 : i32
    %c0_i32_0 = arith.constant 0 : i32
    %c0_i32_1 = arith.constant 0 : i32
    return %arg0, %c0_i32, %c0_i32_0 : i32, i32, i32
  }
  func.func @transform_10(%arg0: i32) -> (i32, i32, i32) {
    %c0_i32 = arith.constant 0 : i32
    %c0_i32_0 = arith.constant 0 : i32
    %c0_i32_1 = arith.constant 0 : i32
    return %arg0, %c0_i32, %c0_i32_0 : i32, i32, i32
  }
  func.func @transform_11(%arg0: i32) -> (i32, i32, i32) {
    %c0_i32 = arith.constant 0 : i32
    %c0_i32_0 = arith.constant 0 : i32
    %c0_i32_1 = arith.constant 0 : i32
    return %arg0, %c0_i32, %c0_i32_0 : i32, i32, i32
  }
  func.func @transform_12(%arg0: i32) -> (i32, i32, i32) {
    %c0_i32 = arith.constant 0 : i32
    %c0_i32_0 = arith.constant 0 : i32
    %c0_i32_1 = arith.constant 0 : i32
    return %arg0, %c0_i32, %c0_i32_0 : i32, i32, i32
  }
  func.func @transform_13(%arg0: i32) -> (i32, i32, i32) {
    %c0_i32 = arith.constant 0 : i32
    %c0_i32_0 = arith.constant 0 : i32
    %c0_i32_1 = arith.constant 0 : i32
    return %arg0, %c0_i32, %c0_i32_0 : i32, i32, i32
  }
}

</mosaic_0001>

<bundles_post_ra>
// kernel: squeeze.6
= control target key start
LH: loop header
LB: loop body
LE: loop exit
PB: predicated region body
PF: predicated region fallthrough
CT: control target
= control target key end

     0   :  { %vm107_vm0 = vcmask 1047556   ;;  %s738_s14 = smov 112   ;;  %s739_s10 = smov 96   ;;  %vm3_vm1 = vcmask 130048   ;;  %s1478_s0 = inlined_call_operand.vmem [shape: f32[1,10,512], index: 0, kind: input, shape index: {}]   ;;  %s1479_s1 = inlined_call_operand.vmem [shape: f32[10,2,16,16], index: 1, kind: output, shape index: {}]  }
   0x1   :  { %v104_v0 = vld [vmem:[%s1478_s0] ss:$8 sm:$0xf]   ;;  %v598_v1 = vld [vmem:[%s1478_s0 - $0x1f] ss:$8 sm:$0xf0]  }
   0x2   :  { %v108_v2 = vsel %vm107_vm0, %v598_v1, %v104_v0  ;;  %v605_v3 = vld [vmem:[%s1478_s0 + $0x4] ss:$8 sm:$0xf]   ;;  %v606_v4 = vld [vmem:[%s1478_s0 - $0x1b] ss:$8 sm:$0xf0]  }
   0x3   :  { %109 = vrot.lane.b32.xlu0 %v108_v2, %s738_s14  ;;  %v134_v5 = vsel %vm107_vm0, %v606_v4, %v605_v3  ;;  %v601_v6 = vld [vmem:[%s1478_s0 + $0x2] ss:$8 sm:$0xf]   ;;  %v602_v7 = vld [vmem:[%s1478_s0 - $0x1d] ss:$8 sm:$0xf0]  }
   0x4   :  { %135 = vrot.lane.b32.xlu1 %v134_v5, %s738_s14  ;;  %v121_v8 = vsel %vm107_vm0, %v602_v7, %v601_v6  ;;  %v609_v9 = vld [vmem:[%s1478_s0 + $0x6] ss:$8 sm:$0xf]   ;;  %v610_v10 = vld [vmem:[%s1478_s0 - $0x19] ss:$8 sm:$0xf0]  }
   0x5   :  { %v147_v11 = vsel %vm107_vm0, %v610_v10, %v609_v9  ;;  %v613_v12 = vld [vmem:[%s1478_s0 + $0x20] ss:$8 sm:$0xf]   ;;  %v614_v13 = vld [vmem:[%s1478_s0 + $0x1] ss:$8 sm:$0xf0]  }
   0x6   :  { %v168_v14 = vld [vmem:[%s1478_s0] ss:$8 sm:$0xf]   ;;  %v617_v15 = vld [vmem:[%s1478_s0 - $0x1f] ss:$8 sm:$0xf0]   ;;  %v160_v16 = vsel %vm107_vm0, %v614_v13, %v613_v12 }
   0x7   :  { %122 = vrot.lane.b32.xlu0 %v121_v8, %s738_s14  ;;  %v172_v17 = vsel %vm107_vm0, %v617_v15, %v168_v14  ;;  %v620_v18 = vld [vmem:[%s1478_s0 + $0x2] ss:$8 sm:$0xf]   ;;  %v621_v19 = vld [vmem:[%s1478_s0 - $0x1d] ss:$8 sm:$0xf0]  }
   0x8   :  { %148 = vrot.lane.b32.xlu1 %v147_v11, %s738_s14  ;;  %v624_v20 = vld [vmem:[%s1478_s0 + $0x4] ss:$8 sm:$0xf]   ;;  %v625_v21 = vld [vmem:[%s1478_s0 - $0x1b] ss:$8 sm:$0xf0]   ;;  %v185_v22 = vsel %vm107_vm0, %v621_v19, %v620_v18 }
   0x9   :  { %v198_v23 = vsel %vm107_vm0, %v625_v21, %v624_v20  ;;  %v628_v24 = vld [vmem:[%s1478_s0 + $0x6] ss:$8 sm:$0xf]   ;;  %v629_v25 = vld [vmem:[%s1478_s0 - $0x19] ss:$8 sm:$0xf0]  }
   0xa   :  { %v632_v26 = vld [vmem:[%s1478_s0 + $0x20] ss:$8 sm:$0xf]   ;;  %v633_v27 = vld [vmem:[%s1478_s0 + $0x1] ss:$8 sm:$0xf0]   ;;  %v211_v28 = vsel %vm107_vm0, %v629_v25, %v628_v24 }
   0xb   :  { %161 = vrot.lane.b32.xlu0 %v160_v16, %s738_s14  ;;  %v224_v29 = vsel %vm107_vm0, %v633_v27, %v632_v26  ;;  %v232_v30 = vld [vmem:[%s1478_s0] ss:$8 sm:$0xf]   ;;  %v636_v31 = vld [vmem:[%s1478_s0 - $0x1f] ss:$8 sm:$0xf0]  }
   0xc   :  { %173 = vrot.lane.b32.xlu1 %v172_v17, %s739_s10  ;;  %v639_v32 = vld [vmem:[%s1478_s0 + $0x2] ss:$8 sm:$0xf]   ;;  %v640_v33 = vld [vmem:[%s1478_s0 - $0x1d] ss:$8 sm:$0xf0]   ;;  %v236_v34 = vsel %vm107_vm0, %v636_v31, %v232_v30 }
   0xd   :  { %v249_v35 = vsel %vm107_vm0, %v640_v33, %v639_v32  ;;  %v643_v36 = vld [vmem:[%s1478_s0 + $0x4] ss:$8 sm:$0xf]   ;;  %v644_v37 = vld [vmem:[%s1478_s0 - $0x1b] ss:$8 sm:$0xf0]  }
   0xe   :  { %v647_v38 = vld [vmem:[%s1478_s0 + $0x6] ss:$8 sm:$0xf]   ;;  %v648_v39 = vld [vmem:[%s1478_s0 - $0x19] ss:$8 sm:$0xf0]   ;;  %v262_v40 = vsel %vm107_vm0, %v644_v37, %v643_v36 }
   0xf   :  { %186 = vrot.lane.b32.xlu0 %v185_v22, %s739_s10  ;;  %s740_s6 = smov 80   ;;  %v275_v41 = vsel %vm107_vm0, %v648_v39, %v647_v38  ;;  %v651_v42 = vld [vmem:[%s1478_s0 + $0x20] ss:$8 sm:$0xf]   ;;  %s741_s23 = smov 64  }
  0x10   :  { %199 = vrot.lane.b32.xlu1 %v198_v23, %s739_s10  ;;  %v652_v43 = vld [vmem:[%s1478_s0 + $0x1] ss:$8 sm:$0xf0]   ;;  %v296_v44 = vld [vmem:[%s1478_s0] ss:$8 sm:$0xf]  }
  0x11   :  { %v655_v45 = vld [vmem:[%s1478_s0 - $0x1f] ss:$8 sm:$0xf0]   ;;  %v288_v46 = vsel %vm107_vm0, %v652_v43, %v651_v42  ;;  %v658_v48 = vld [vmem:[%s1478_s0 + $0x2] ss:$8 sm:$0xf]  }
  0x12   :  { %v300_v47 = vsel %vm107_vm0, %v655_v45, %v296_v44  ;;  %v659_v49 = vld [vmem:[%s1478_s0 - $0x1d] ss:$8 sm:$0xf0]   ;;  %v662_v50 = vld [vmem:[%s1478_s0 + $0x4] ss:$8 sm:$0xf]  }
  0x13   :  { %212 = vrot.lane.b32.xlu0 %v211_v28, %s739_s10  ;;  %v663_v51 = vld [vmem:[%s1478_s0 - $0x1b] ss:$8 sm:$0xf0]   ;;  %v313_v52 = vsel %vm107_vm0, %v659_v49, %v658_v48  ;;  %v666_v53 = vld [vmem:[%s1478_s0 + $0x6] ss:$8 sm:$0xf]  }
  0x14   :  { %225 = vrot.lane.b32.xlu1 %v224_v29, %s739_s10  ;;  %v326_v54 = vsel %vm107_vm0, %v663_v51, %v662_v50  ;;  %v667_v55 = vld [vmem:[%s1478_s0 - $0x19] ss:$8 sm:$0xf0]   ;;  %v670_v56 = vld [vmem:[%s1478_s0 + $0x20] ss:$8 sm:$0xf]  }
  0x15   :  { %v671_v57 = vld [vmem:[%s1478_s0 + $0x1] ss:$8 sm:$0xf0]   ;;  %v719_v58 = vld [vmem:[%s1478_s0 + $0x4] ss:$8 sm:$0xf]   ;;  %v339_v62 = vsel %vm107_vm0, %v667_v55, %v666_v53 }
  0x16   :  { %v360_v59 = vld [vmem:[%s1478_s0] ss:$8 sm:$0xf]   ;;  %v720_v60 = vld [vmem:[%s1478_s0 - $0x1b] ss:$8 sm:$0xf0]   ;;  %v352_v2 = vsel %vm107_vm0, %v671_v57, %v670_v56 }
  0x17   :  { %237 = vrot.lane.b32.xlu0 %v236_v34, %s740_s6  ;;  %v723_v61 = vld [vmem:[%s1478_s0 + $0x6] ss:$8 sm:$0xf]   ;;  %v907_v63 = vsel %vm107_vm0, %v720_v60, %v719_v58  ;;  %v724_v0 = vld [vmem:[%s1478_s0 - $0x19] ss:$8 sm:$0xf0]  }
  0x18   :  { %250 = vrot.lane.b32.xlu1 %v249_v35, %s740_s6  ;;  %v727_v1 = vld [vmem:[%s1478_s0 + $0x20] ss:$8 sm:$0xf]   ;;  %v674_v3 = vld [vmem:[%s1478_s0 - $0x1f] ss:$8 sm:$0xf0]   ;;  %v920_v4 = vsel %vm107_vm0, %v724_v0, %v723_v61 }
  0x19   :  { %v728_v5 = vld [vmem:[%s1478_s0 + $0x1] ss:$8 sm:$0xf0]   ;;  %v677_v6 = vld [vmem:[%s1478_s0 + $0x2] ss:$8 sm:$0xf]   ;;  %v364_v9 = vsel %vm107_vm0, %v674_v3, %v360_v59 }
  0x1a   :  { %v678_v7 = vld [vmem:[%s1478_s0 - $0x1d] ss:$8 sm:$0xf0]   ;;  %v932_v8 = vsel %vm107_vm0, %v728_v5, %v727_v1  ;;  %v681_v11 = vld [vmem:[%s1478_s0 + $0x4] ss:$8 sm:$0xf]  }
  0x1b   :  { %263 = vrot.lane.b32.xlu0 %v262_v40, %s740_s6  ;;  %v377_v10 = vsel %vm107_vm0, %v678_v7, %v677_v6  ;;  %v682_v12 = vld [vmem:[%s1478_s0 - $0x1b] ss:$8 sm:$0xf0]   ;;  %v685_v13 = vld [vmem:[%s1478_s0 + $0x6] ss:$8 sm:$0xf]  }
  0x1c   :  { %276 = vrot.lane.b32.xlu1 %v275_v41, %s740_s6  ;;  %v686_v14 = vld [vmem:[%s1478_s0 - $0x19] ss:$8 sm:$0xf0]   ;;  %s742_s2 = smov 48   ;;  %v390_v15 = vsel %vm107_vm0, %v682_v12, %v681_v11  ;;  %s743_s19 = smov 32  }
  0x1d   :  { %v403_v16 = vsel %vm107_vm0, %v686_v14, %v685_v13  ;;  %v689_v17 = vld [vmem:[%s1478_s0 + $0x20] ss:$8 sm:$0xf]   ;;  %v690_v18 = vld [vmem:[%s1478_s0 + $0x1] ss:$8 sm:$0xf0]  }
  0x1e   :  { %v424_v19 = vld [vmem:[%s1478_s0] ss:$8 sm:$0xf]   ;;  %v693_v20 = vld [vmem:[%s1478_s0 - $0x1f] ss:$8 sm:$0xf0]   ;;  %v416_v21 = vsel %vm107_vm0, %v690_v18, %v689_v17 }
  0x1f   :  { %289 = vrot.lane.b32.xlu0 %v288_v46, %s740_s6  ;;  %v428_v22 = vsel %vm107_vm0, %v693_v20, %v424_v19  ;;  %v696_v23 = vld [vmem:[%s1478_s0 + $0x2] ss:$8 sm:$0xf]   ;;  %v697_v24 = vld [vmem:[%s1478_s0 - $0x1d] ss:$8 sm:$0xf0]  }
  0x20   :  { %301 = vrot.lane.b32.xlu1 %v300_v47, %s741_s23  ;;  %v700_v25 = vld [vmem:[%s1478_s0 + $0x4] ss:$8 sm:$0xf]   ;;  %v701_v26 = vld [vmem:[%s1478_s0 - $0x1b] ss:$8 sm:$0xf0]   ;;  %v441_v27 = vsel %vm107_vm0, %v697_v24, %v696_v23 }
  0x21   :  { %v454_v28 = vsel %vm107_vm0, %v701_v26, %v700_v25  ;;  %v704_v29 = vld [vmem:[%s1478_s0 + $0x6] ss:$8 sm:$0xf]   ;;  %v705_v30 = vld [vmem:[%s1478_s0 - $0x19] ss:$8 sm:$0xf0]  }
  0x22   :  { %v708_v31 = vld [vmem:[%s1478_s0 + $0x20] ss:$8 sm:$0xf]   ;;  %v709_v32 = vld [vmem:[%s1478_s0 + $0x1] ss:$8 sm:$0xf0]   ;;  %v467_v35 = vsel %vm107_vm0, %v705_v30, %v704_v29 }
  0x23   :  { %314 = vrot.lane.b32.xlu0 %v313_v52, %s741_s23  ;;  %v488_v33 = vld [vmem:[%s1478_s0] ss:$8 sm:$0xf]   ;;  %v712_v34 = vld [vmem:[%s1478_s0 - $0x1f] ss:$8 sm:$0xf0]   ;;  %v480_v38 = vsel %vm107_vm0, %v709_v32, %v708_v31 }
  0x24   :  { %327 = vrot.lane.b32.xlu1 %v326_v54, %s741_s23  ;;  %v715_v36 = vld [vmem:[%s1478_s0 + $0x2] ss:$8 sm:$0xf]   ;;  %v716_v37 = vld [vmem:[%s1478_s0 - $0x1d] ss:$8 sm:$0xf0]   ;;  %v492_v47 = vsel %vm107_vm0, %v712_v34, %v488_v33 }
  0x25   :  { %v2_v39 = vld [vmem:[%s1478_s0] sm:$0xff]   ;;  %v559_v40 = vld [vmem:[%s1478_s0 + $0x8] sm:$0xff]   ;;  %v568_v41 = vld [vmem:[%s1478_s0 + $0x10] sm:$0xff]   ;;  %v505_v48 = vsel %vm107_vm0, %v716_v37, %v715_v36  ;;  %s744_s17 = smov 16  }
  0x26   :  { %4 = vst.msk [vmem:[%s1479_s1] sm:$0x1] %vm3_vm1, %v2_v39   ;;  %552 = vst.msk [vmem:[%s1479_s1 + $0x1f] sm:$0x2] %vm3_vm1, %v2_v39   ;;  %v577_v42 = vld [vmem:[%s1478_s0 + $0x18] sm:$0xff]  }
  0x27   :  { %340 = vrot.lane.b32.xlu0 %v339_v62, %s741_s23  ;;  %553 = vst.msk [vmem:[%s1479_s1 + $0x3e] sm:$0x4] %vm3_vm1, %v2_v39   ;;  %554 = vst.msk [vmem:[%s1479_s1 + $0x5d] sm:$0x8] %vm3_vm1, %v2_v39   ;;  %v586_v43 = vld [vmem:[%s1478_s0 + $0x20] sm:$0x3]  }
  0x28   :  { %353 = vrot.lane.b32.xlu1 %v352_v2, %s741_s23  ;;  %555 = vst.msk [vmem:[%s1479_s1 + $0x7c] sm:$0x10] %vm3_vm1, %v2_v39   ;;  %556 = vst.msk [vmem:[%s1479_s1 + $0x9b] sm:$0x20] %vm3_vm1, %v2_v39   ;;  %v589_v44 = vld [vmem:[%s1478_s0 + $0x28] sm:$0x3]  }
  0x29   :  { %557 = vst.msk [vmem:[%s1479_s1 + $0xba] sm:$0x40] %vm3_vm1, %v2_v39   ;;  %558 = vst.msk [vmem:[%s1479_s1 + $0xd9] sm:$0x80] %vm3_vm1, %v2_v39   ;;  %v592_v45 = vld [vmem:[%s1478_s0 + $0x30] sm:$0x3]  }
  0x2a   :  { %560 = vst.msk [vmem:[%s1479_s1 + $0x8] sm:$0x1] %vm3_vm1, %v559_v40   ;;  %561 = vst.msk [vmem:[%s1479_s1 + $0x27] sm:$0x2] %vm3_vm1, %v559_v40   ;;  %v595_v46 = vld [vmem:[%s1478_s0 + $0x38] sm:$0x3]  }
  0x2b   :  { %365 = vrot.lane.b32.xlu0 %v364_v9, %s742_s2  ;;  %562 = vst.msk [vmem:[%s1479_s1 + $0x46] sm:$0x4] %vm3_vm1, %v559_v40   ;;  %563 = vst.msk [vmem:[%s1479_s1 + $0x65] sm:$0x8] %vm3_vm1, %v559_v40  }
  0x2c   :  { %378 = vrot.lane.b32.xlu1 %v377_v10, %s742_s2  ;;  %564 = vst.msk [vmem:[%s1479_s1 + $0x84] sm:$0x10] %vm3_vm1, %v559_v40   ;;  %565 = vst.msk [vmem:[%s1479_s1 + $0xa3] sm:$0x20] %vm3_vm1, %v559_v40  }
  0x2d   :  { %566 = vst.msk [vmem:[%s1479_s1 + $0xc2] sm:$0x40] %vm3_vm1, %v559_v40   ;;  %567 = vst.msk [vmem:[%s1479_s1 + $0xe1] sm:$0x80] %vm3_vm1, %v559_v40  }
  0x2e   :  { %569 = vst.msk [vmem:[%s1479_s1 + $0x10] sm:$0x1] %vm3_vm1, %v568_v41   ;;  %570 = vst.msk [vmem:[%s1479_s1 + $0x2f] sm:$0x2] %vm3_vm1, %v568_v41  }
  0x2f   :  { %391 = vrot.lane.b32.xlu0 %v390_v15, %s742_s2  ;;  %571 = vst.msk [vmem:[%s1479_s1 + $0x4e] sm:$0x4] %vm3_vm1, %v568_v41   ;;  %572 = vst.msk [vmem:[%s1479_s1 + $0x6d] sm:$0x8] %vm3_vm1, %v568_v41  }
  0x30   :  { %404 = vrot.lane.b32.xlu1 %v403_v16, %s742_s2  ;;  %573 = vst.msk [vmem:[%s1479_s1 + $0x8c] sm:$0x10] %vm3_vm1, %v568_v41   ;;  %574 = vst.msk [vmem:[%s1479_s1 + $0xab] sm:$0x20] %vm3_vm1, %v568_v41  }
  0x31   :  { %575 = vst.msk [vmem:[%s1479_s1 + $0xca] sm:$0x40] %vm3_vm1, %v568_v41   ;;  %576 = vst.msk [vmem:[%s1479_s1 + $0xe9] sm:$0x80] %vm3_vm1, %v568_v41  }
  0x32   :  { %578 = vst.msk [vmem:[%s1479_s1 + $0x18] sm:$0x1] %vm3_vm1, %v577_v42   ;;  %579 = vst.msk [vmem:[%s1479_s1 + $0x37] sm:$0x2] %vm3_vm1, %v577_v42  }
  0x33   :  { %417 = vrot.lane.b32.xlu0 %v416_v21, %s742_s2  ;;  %580 = vst.msk [vmem:[%s1479_s1 + $0x56] sm:$0x4] %vm3_vm1, %v577_v42   ;;  %581 = vst.msk [vmem:[%s1479_s1 + $0x75] sm:$0x8] %vm3_vm1, %v577_v42  }
  0x34   :  { %429 = vrot.lane.b32.xlu1 %v428_v22, %s743_s19  ;;  %582 = vst.msk [vmem:[%s1479_s1 + $0x94] sm:$0x10] %vm3_vm1, %v577_v42   ;;  %583 = vst.msk [vmem:[%s1479_s1 + $0xb3] sm:$0x20] %vm3_vm1, %v577_v42  }
  0x35   :  { %584 = vst.msk [vmem:[%s1479_s1 + $0xd2] sm:$0x40] %vm3_vm1, %v577_v42   ;;  %585 = vst.msk [vmem:[%s1479_s1 + $0xf1] sm:$0x80] %vm3_vm1, %v577_v42  }
  0x36   :  { %587 = vst.msk [vmem:[%s1479_s1 + $0x100] sm:$0x1] %vm3_vm1, %v586_v43   ;;  %588 = vst.msk [vmem:[%s1479_s1 + $0x11f] sm:$0x2] %vm3_vm1, %v586_v43  }
  0x37   :  { %442 = vrot.lane.b32.xlu0 %v441_v27, %s743_s19  ;;  %590 = vst.msk [vmem:[%s1479_s1 + $0x108] sm:$0x1] %vm3_vm1, %v589_v44   ;;  %591 = vst.msk [vmem:[%s1479_s1 + $0x127] sm:$0x2] %vm3_vm1, %v589_v44  }
  0x38   :  { %455 = vrot.lane.b32.xlu1 %v454_v28, %s743_s19  ;;  %593 = vst.msk [vmem:[%s1479_s1 + $0x110] sm:$0x1] %vm3_vm1, %v592_v45   ;;  %594 = vst.msk [vmem:[%s1479_s1 + $0x12f] sm:$0x2] %vm3_vm1, %v592_v45  }
  0x39   :  { %596 = vst.msk [vmem:[%s1479_s1 + $0x118] sm:$0x1] %vm3_vm1, %v595_v46   ;;  %597 = vst.msk [vmem:[%s1479_s1 + $0x137] sm:$0x2] %vm3_vm1, %v595_v46  }
  0x3b   :  { %468 = vrot.lane.b32.xlu0 %v467_v35, %s743_s19 }
  0x3c   :  { %481 = vrot.lane.b32.xlu1 %v480_v38, %s743_s19 }
  0x3f   :  { %493 = vrot.lane.b32.xlu0 %v492_v47, %s744_s17 }
  0x40   :  { %506 = vrot.lane.b32.xlu1 %v505_v48, %s744_s17 }
  0x43   :  { %519 = vrot.lane.b32.xlu0 %v907_v63, %s744_s17 }
  0x44   :  { %532 = vrot.lane.b32.xlu1 %v920_v4, %s744_s17 }
  0x47   :  { %545 = vrot.lane.b32.xlu0 %v932_v8, %s744_s17 }
  0x75   :  { %v110_v49 = vpop.permute.xlu0 %109  }
  0x76   :  { %599 = vst.msk [vmem:[%s1479_s1 + $0x1] ss:$8 sm:$0xf] %vm3_vm1, %v110_v49   ;;  %600 = vst.msk [vmem:[%s1479_s1 + $0x1] ss:$8 sm:$0xf0] %vm3_vm1, %v110_v49   ;;  %v136_v50 = vpop.permute.xlu1 %135  }
  0x77   :  { %607 = vst.msk [vmem:[%s1479_s1 + $0x81] ss:$8 sm:$0xf] %vm3_vm1, %v136_v50   ;;  %608 = vst.msk [vmem:[%s1479_s1 + $0x81] ss:$8 sm:$0xf0] %vm3_vm1, %v136_v50  }
  0x79   :  { %v123_v51 = vpop.permute.xlu0 %122  }
  0x7a   :  { %603 = vst.msk [vmem:[%s1479_s1 + $0x41] ss:$8 sm:$0xf] %vm3_vm1, %v123_v51   ;;  %604 = vst.msk [vmem:[%s1479_s1 + $0x41] ss:$8 sm:$0xf0] %vm3_vm1, %v123_v51   ;;  %v149_v52 = vpop.permute.xlu1 %148  }
  0x7b   :  { %611 = vst.msk [vmem:[%s1479_s1 + $0xc1] ss:$8 sm:$0xf] %vm3_vm1, %v149_v52   ;;  %612 = vst.msk [vmem:[%s1479_s1 + $0xc1] ss:$8 sm:$0xf0] %vm3_vm1, %v149_v52  }
  0x7d   :  { %v162_v53 = vpop.permute.xlu0 %161  }
  0x7e   :  { %615 = vst.msk [vmem:[%s1479_s1 + $0x101] ss:$8 sm:$0xf] %vm3_vm1, %v162_v53   ;;  %616 = vst.msk [vmem:[%s1479_s1 + $0x101] ss:$8 sm:$0xf0] %vm3_vm1, %v162_v53   ;;  %v174_v54 = vpop.permute.xlu1 %173  }
  0x7f   :  { %618 = vst.msk [vmem:[%s1479_s1 + $0x2] ss:$8 sm:$0xf] %vm3_vm1, %v174_v54   ;;  %619 = vst.msk [vmem:[%s1479_s1 + $0x2] ss:$8 sm:$0xf0] %vm3_vm1, %v174_v54  }
  0x81   :  { %v187_v55 = vpop.permute.xlu0 %186  }
  0x82   :  { %622 = vst.msk [vmem:[%s1479_s1 + $0x42] ss:$8 sm:$0xf] %vm3_vm1, %v187_v55   ;;  %623 = vst.msk [vmem:[%s1479_s1 + $0x42] ss:$8 sm:$0xf0] %vm3_vm1, %v187_v55   ;;  %v200_v56 = vpop.permute.xlu1 %199  }
  0x83   :  { %626 = vst.msk [vmem:[%s1479_s1 + $0x82] ss:$8 sm:$0xf] %vm3_vm1, %v200_v56   ;;  %627 = vst.msk [vmem:[%s1479_s1 + $0x82] ss:$8 sm:$0xf0] %vm3_vm1, %v200_v56  }
  0x85   :  { %v213_v57 = vpop.permute.xlu0 %212  }
  0x86   :  { %630 = vst.msk [vmem:[%s1479_s1 + $0xc2] ss:$8 sm:$0xf] %vm3_vm1, %v213_v57   ;;  %631 = vst.msk [vmem:[%s1479_s1 + $0xc2] ss:$8 sm:$0xf0] %vm3_vm1, %v213_v57   ;;  %v226_v58 = vpop.permute.xlu1 %225  }
  0x87   :  { %634 = vst.msk [vmem:[%s1479_s1 + $0x102] ss:$8 sm:$0xf] %vm3_vm1, %v226_v58   ;;  %635 = vst.msk [vmem:[%s1479_s1 + $0x102] ss:$8 sm:$0xf0] %vm3_vm1, %v226_v58  }
  0x89   :  { %v238_v59 = vpop.permute.xlu0 %237  }
  0x8a   :  { %637 = vst.msk [vmem:[%s1479_s1 + $0x3] ss:$8 sm:$0xf] %vm3_vm1, %v238_v59   ;;  %638 = vst.msk [vmem:[%s1479_s1 + $0x3] ss:$8 sm:$0xf0] %vm3_vm1, %v238_v59   ;;  %v251_v60 = vpop.permute.xlu1 %250  }
  0x8b   :  { %641 = vst.msk [vmem:[%s1479_s1 + $0x43] ss:$8 sm:$0xf] %vm3_vm1, %v251_v60   ;;  %642 = vst.msk [vmem:[%s1479_s1 + $0x43] ss:$8 sm:$0xf0] %vm3_vm1, %v251_v60  }
  0x8d   :  { %v264_v61 = vpop.permute.xlu0 %263  }
  0x8e   :  { %645 = vst.msk [vmem:[%s1479_s1 + $0x83] ss:$8 sm:$0xf] %vm3_vm1, %v264_v61   ;;  %646 = vst.msk [vmem:[%s1479_s1 + $0x83] ss:$8 sm:$0xf0] %vm3_vm1, %v264_v61   ;;  %v277_v62 = vpop.permute.xlu1 %276  }
  0x8f   :  { %649 = vst.msk [vmem:[%s1479_s1 + $0xc3] ss:$8 sm:$0xf] %vm3_vm1, %v277_v62   ;;  %650 = vst.msk [vmem:[%s1479_s1 + $0xc3] ss:$8 sm:$0xf0] %vm3_vm1, %v277_v62  }
  0x91   :  { %v290_v63 = vpop.permute.xlu0 %289  }
  0x92   :  { %653 = vst.msk [vmem:[%s1479_s1 + $0x103] ss:$8 sm:$0xf] %vm3_vm1, %v290_v63   ;;  %654 = vst.msk [vmem:[%s1479_s1 + $0x103] ss:$8 sm:$0xf0] %vm3_vm1, %v290_v63   ;;  %v302_v0 = vpop.permute.xlu1 %301  }
  0x93   :  { %656 = vst.msk [vmem:[%s1479_s1 + $0x4] ss:$8 sm:$0xf] %vm3_vm1, %v302_v0   ;;  %657 = vst.msk [vmem:[%s1479_s1 + $0x4] ss:$8 sm:$0xf0] %vm3_vm1, %v302_v0  }
  0x95   :  { %v315_v1 = vpop.permute.xlu0 %314  }
  0x96   :  { %660 = vst.msk [vmem:[%s1479_s1 + $0x44] ss:$8 sm:$0xf] %vm3_vm1, %v315_v1   ;;  %661 = vst.msk [vmem:[%s1479_s1 + $0x44] ss:$8 sm:$0xf0] %vm3_vm1, %v315_v1   ;;  %v328_v2 = vpop.permute.xlu1 %327  }
  0x97   :  { %664 = vst.msk [vmem:[%s1479_s1 + $0x84] ss:$8 sm:$0xf] %vm3_vm1, %v328_v2   ;;  %665 = vst.msk [vmem:[%s1479_s1 + $0x84] ss:$8 sm:$0xf0] %vm3_vm1, %v328_v2  }
  0x99   :  { %v341_v3 = vpop.permute.xlu0 %340  }
  0x9a   :  { %668 = vst.msk [vmem:[%s1479_s1 + $0xc4] ss:$8 sm:$0xf] %vm3_vm1, %v341_v3   ;;  %669 = vst.msk [vmem:[%s1479_s1 + $0xc4] ss:$8 sm:$0xf0] %vm3_vm1, %v341_v3   ;;  %v354_v4 = vpop.permute.xlu1 %353  }
  0x9b   :  { %672 = vst.msk [vmem:[%s1479_s1 + $0x104] ss:$8 sm:$0xf] %vm3_vm1, %v354_v4   ;;  %673 = vst.msk [vmem:[%s1479_s1 + $0x104] ss:$8 sm:$0xf0] %vm3_vm1, %v354_v4  }
  0x9d   :  { %v366_v5 = vpop.permute.xlu0 %365  }
  0x9e   :  { %675 = vst.msk [vmem:[%s1479_s1 + $0x5] ss:$8 sm:$0xf] %vm3_vm1, %v366_v5   ;;  %676 = vst.msk [vmem:[%s1479_s1 + $0x5] ss:$8 sm:$0xf0] %vm3_vm1, %v366_v5   ;;  %v379_v6 = vpop.permute.xlu1 %378  }
  0x9f   :  { %679 = vst.msk [vmem:[%s1479_s1 + $0x45] ss:$8 sm:$0xf] %vm3_vm1, %v379_v6   ;;  %680 = vst.msk [vmem:[%s1479_s1 + $0x45] ss:$8 sm:$0xf0] %vm3_vm1, %v379_v6  }
  0xa1   :  { %v392_v7 = vpop.permute.xlu0 %391  }
  0xa2   :  { %683 = vst.msk [vmem:[%s1479_s1 + $0x85] ss:$8 sm:$0xf] %vm3_vm1, %v392_v7   ;;  %684 = vst.msk [vmem:[%s1479_s1 + $0x85] ss:$8 sm:$0xf0] %vm3_vm1, %v392_v7   ;;  %v405_v8 = vpop.permute.xlu1 %404  }
  0xa3   :  { %687 = vst.msk [vmem:[%s1479_s1 + $0xc5] ss:$8 sm:$0xf] %vm3_vm1, %v405_v8   ;;  %688 = vst.msk [vmem:[%s1479_s1 + $0xc5] ss:$8 sm:$0xf0] %vm3_vm1, %v405_v8  }
  0xa5   :  { %v418_v9 = vpop.permute.xlu0 %417  }
  0xa6   :  { %691 = vst.msk [vmem:[%s1479_s1 + $0x105] ss:$8 sm:$0xf] %vm3_vm1, %v418_v9   ;;  %692 = vst.msk [vmem:[%s1479_s1 + $0x105] ss:$8 sm:$0xf0] %vm3_vm1, %v418_v9   ;;  %v430_v10 = vpop.permute.xlu1 %429  }
  0xa7   :  { %694 = vst.msk [vmem:[%s1479_s1 + $0x6] ss:$8 sm:$0xf] %vm3_vm1, %v430_v10   ;;  %695 = vst.msk [vmem:[%s1479_s1 + $0x6] ss:$8 sm:$0xf0] %vm3_vm1, %v430_v10  }
  0xa9   :  { %v443_v11 = vpop.permute.xlu0 %442  }
  0xaa   :  { %698 = vst.msk [vmem:[%s1479_s1 + $0x46] ss:$8 sm:$0xf] %vm3_vm1, %v443_v11   ;;  %699 = vst.msk [vmem:[%s1479_s1 + $0x46] ss:$8 sm:$0xf0] %vm3_vm1, %v443_v11   ;;  %v456_v12 = vpop.permute.xlu1 %455  }
  0xab   :  { %702 = vst.msk [vmem:[%s1479_s1 + $0x86] ss:$8 sm:$0xf] %vm3_vm1, %v456_v12   ;;  %703 = vst.msk [vmem:[%s1479_s1 + $0x86] ss:$8 sm:$0xf0] %vm3_vm1, %v456_v12  }
  0xad   :  { %v469_v13 = vpop.permute.xlu0 %468  }
  0xae   :  { %706 = vst.msk [vmem:[%s1479_s1 + $0xc6] ss:$8 sm:$0xf] %vm3_vm1, %v469_v13   ;;  %707 = vst.msk [vmem:[%s1479_s1 + $0xc6] ss:$8 sm:$0xf0] %vm3_vm1, %v469_v13   ;;  %v482_v14 = vpop.permute.xlu1 %481  }
  0xaf   :  { %710 = vst.msk [vmem:[%s1479_s1 + $0x106] ss:$8 sm:$0xf] %vm3_vm1, %v482_v14   ;;  %711 = vst.msk [vmem:[%s1479_s1 + $0x106] ss:$8 sm:$0xf0] %vm3_vm1, %v482_v14  }
  0xb1   :  { %v494_v15 = vpop.permute.xlu0 %493  }
  0xb2   :  { %713 = vst.msk [vmem:[%s1479_s1 + $0x7] ss:$8 sm:$0xf] %vm3_vm1, %v494_v15   ;;  %714 = vst.msk [vmem:[%s1479_s1 + $0x7] ss:$8 sm:$0xf0] %vm3_vm1, %v494_v15   ;;  %v507_v16 = vpop.permute.xlu1 %506  }
  0xb3   :  { %717 = vst.msk [vmem:[%s1479_s1 + $0x47] ss:$8 sm:$0xf] %vm3_vm1, %v507_v16   ;;  %718 = vst.msk [vmem:[%s1479_s1 + $0x47] ss:$8 sm:$0xf0] %vm3_vm1, %v507_v16  }
  0xb5   :  { %v520_v17 = vpop.permute.xlu0 %519  }
  0xb6   :  { %721 = vst.msk [vmem:[%s1479_s1 + $0x87] ss:$8 sm:$0xf] %vm3_vm1, %v520_v17   ;;  %722 = vst.msk [vmem:[%s1479_s1 + $0x87] ss:$8 sm:$0xf0] %vm3_vm1, %v520_v17   ;;  %v533_v18 = vpop.permute.xlu1 %532  }
  0xb7   :  { %725 = vst.msk [vmem:[%s1479_s1 + $0xc7] ss:$8 sm:$0xf] %vm3_vm1, %v533_v18   ;;  %726 = vst.msk [vmem:[%s1479_s1 + $0xc7] ss:$8 sm:$0xf0] %vm3_vm1, %v533_v18  }
  0xb9   :  { %v546_v19 = vpop.permute.xlu0 %545  }
  0xba   :  { %729 = vst.msk [vmem:[%s1479_s1 + $0x107] ss:$8 sm:$0xf] %vm3_vm1, %v546_v19   ;;  %730 = vst.msk [vmem:[%s1479_s1 + $0x107] ss:$8 sm:$0xf0] %vm3_vm1, %v546_v19  }

// kernel: squeeze.9
= control target key start
LH: loop header
LB: loop body
LE: loop exit
PB: predicated region body
PF: predicated region fallthrough
CT: control target
= control target key end

     0   :  { %s135_s0 = inlined_call_operand.vmem [shape: f32[512], index: 0, kind: input, shape index: {}]   ;;  %s136_s1 = inlined_call_operand.hbm [shape: f32[2,1,16,16], index: 1, kind: output, shape index: {}]  }
   0x1   :  { %v5_v0 = vld [vmem:[%s135_s0] sm:$0xf] }
   0x2   :  { %6 = vst [vmem:[#allocation2] sm:$0xf] %v5_v0 }
   0x3   :  { %2 = vsyncpa [#allocation1], 0  ;;  %s94_s0 = smov 112   ;;  %s95_s8 = smov 80   ;;  %vm8_vm0 = vcmask 130048  }
   0x4   :  { %s96_s9 = smov 96   ;;  %s97_s10 = smov 64  }
   0x5   :  { %s98_s11 = smov 48   ;;  %s99_s12 = smov 32  }
   0x6   :  { %s100_s13 = smov 16   ;;  %s101_s14 = smov [#allocation0]  }
   0x7   :  { %s56_s15 = sshll.u32 %s101_s14, 4  ;;  %s57_s15 = int_to_ptr.vmem [resolvable:$true] %s56_s15 }
   0x8   :  { %s70_s16 = scalar_lea.vmem %s57_s15, 512  ;;  %p75_p1 = scmp.lt.s32.totalorder %s57_s15, %s57_s15 }
   0x9   :  { %v10_v1 = vld [vmem:[#allocation2] sm:$0xf]   ;;  %p71_p0 = scmp.ne.s32.totalorder %s57_s15, %s70_s16  ;;  %p76_p2 = scmp.lt.s32.totalorder %s70_s16, %s70_s16 }
   0xa   :  { %v22_v2 = vld [vmem:[#allocation2] sm:$0xf]   ;;  %11 = vrot.lane.b32.xlu0 %v10_v1, %s94_s0 }
   0xb   :  { %23 = vrot.lane.b32.xlu1 %v22_v2, %s95_s8  ;;  %v16_v3 = vld [vmem:[#allocation2] sm:$0xf]   ;;  %p77_p3 = por %p76_p2, %p75_p1 }
   0xc   :  { %v28_v4 = vld [vmem:[#allocation2] sm:$0xf]  }
   0xd   :  { %v7_v5 = vld [vmem:[#allocation2] sm:$0xf]   ;;  %p78_p4 = pnand %p77_p3, %p71_p0 }
   0xe   :  { %9 = vst.msk [vmem:[#allocation0] ss:$8 sm:$0xf] %vm8_vm0, %v7_v5   ;;  %17 = vrot.lane.b32.xlu0 %v16_v3, %s96_s9  ;;  %v34_v6 = vld [vmem:[#allocation2] sm:$0xf]  }
   0xf   :  { %29 = vrot.lane.b32.xlu1 %v28_v4, %s97_s10  ;;  %v40_v7 = vld [vmem:[#allocation2] sm:$0xf]  }
  0x10   :  { %v46_v8 = vld [vmem:[#allocation2] sm:$0xf]  }
  0x12   :  { %35 = vrot.lane.b32.xlu0 %v34_v6, %s98_s11 }
  0x13   :  { %41 = vrot.lane.b32.xlu1 %v40_v7, %s99_s12 }
  0x16   :  { %47 = vrot.lane.b32.xlu0 %v46_v8, %s100_s13 }
  0x7c   :  { %v12_v9 = vpop.permute.xlu0 %11  }
  0x7d   :  { %v24_v10 = vpop.permute.xlu1 %23   ;;  %15 = vst.msk [vmem:[#allocation0 + $0x1] ss:$8 sm:$0xf] %vm8_vm0, %v12_v9  }
  0x7e   :  { %27 = vst.msk [vmem:[#allocation0 + $0x3] ss:$8 sm:$0xf] %vm8_vm0, %v24_v10  }
  0x80   :  { %v18_v11 = vpop.permute.xlu0 %17  }
  0x81   :  { %v30_v12 = vpop.permute.xlu1 %29   ;;  %21 = vst.msk [vmem:[#allocation0 + $0x2] ss:$8 sm:$0xf] %vm8_vm0, %v18_v11  }
  0x82   :  { %33 = vst.msk [vmem:[#allocation0 + $0x4] ss:$8 sm:$0xf] %vm8_vm0, %v30_v12  }
  0x84   :  { %v36_v13 = vpop.permute.xlu0 %35  }
  0x85   :  { %v42_v14 = vpop.permute.xlu1 %41   ;;  %39 = vst.msk [vmem:[#allocation0 + $0x5] ss:$8 sm:$0xf] %vm8_vm0, %v36_v13  }
  0x86   :  { %45 = vst.msk [vmem:[#allocation0 + $0x6] ss:$8 sm:$0xf] %vm8_vm0, %v42_v14  }
  0x88   :  { %v48_v15 = vpop.permute.xlu0 %47  }
  0x89   :  { %51 = vst.msk [vmem:[#allocation0 + $0x7] ss:$8 sm:$0xf] %vm8_vm0, %v48_v15  }
  0x8a   :  { %81 = shalt.err (!%p78_p4)
}
  0x8b   :  { %s82_s19 = scalar_lea.hbm %s136_s1, 512 }
  0x8c   :  { %p83_p5 = scmp.ne.s32.totalorder %s136_s1, %s82_s19  ;;  %p86_p6 = scmp.lt.u32.totalorder %s82_s19, %s136_s1 }
  0x8e   :  { %p88_p7 = pnand %p86_p6, %p83_p5 }
  0x90   :  { %91 = shalt.err (!%p88_p7)
}
  0x91   :  { %59 = dma.vmem_to_hbm [thread:$0]  %s57_s15, 512, %s136_s1, [#allocation1]  }
  0x92   :  { %92 = dma.done.wait [#allocation1], 512  }
  0x93   :  { %93 = vsyncadd [#allocation1], 4294966784 }
  0x94   :  { %61 = vsyncpa [#allocation1], 1 }

// kernel: dep_context_forward.1
= control target key start
LH: loop header
LB: loop body
LE: loop exit
PB: predicated region body
PF: predicated region fallthrough
CT: control target
= control target key end

     0   :  { %s2132_s25 = smov 0   ;;  %s2536_s0 = inlined_call_operand.vmem [shape: f32[40,128], index: 0, kind: input, shape index: {}]   ;;  %s2537_s1 = inlined_call_operand.vmem [shape: f32[3,1,128], index: 1, kind: input, shape index: {}]   ;;  %s2538_s2 = inlined_call_operand.vmem [shape: f32[64,40], index: 2, kind: input, shape index: {}]   ;;  %s2539_s3 = inlined_call_operand.vmem [shape: f32[64,1], index: 3, kind: input, shape index: {}]   ;;  %s2540_s4 = inlined_call_operand.vmem [shape: f32[64,40], index: 4, kind: input, shape index: {}]   ;;  %s2541_s5 = inlined_call_operand.vmem [shape: f32[64,1], index: 5, kind: input, shape index: {}]   ;;  %s2542_s6 = inlined_call_operand.vmem [shape: f32[32,512], index: 6, kind: input, shape index: {}]   ;;  %s2543_s7 = inlined_call_operand.vmem [shape: f32[3,1,512], index: 7, kind: input, shape index: {}]   ;;  %s2544_s8 = inlined_call_operand.vmem [shape: f32[64,256], index: 8, kind: input, shape index: {}]   ;;  %s2545_s9 = inlined_call_operand.vmem [shape: f32[3,10,32], index: 9, kind: input, shape index: {}]   ;;  %s2546_s10 = inlined_call_operand.vmem [shape: f32[3,10,1], index: 10, kind: input, shape index: {}]   ;;  %s2547_s11 = inlined_call_operand.vmem [shape: f32[3,10,1], index: 11, kind: input, shape index: {}]   ;;  %s2548_s12 = inlined_call_operand.vmem [shape: f32[3,10,512], index: 12, kind: output, shape index: {0}]   ;;  %s2549_s13 = inlined_call_operand.vmem [shape: f32[3,1,512], index: 13, kind: output, shape index: {1}]  }
   0x1 LB: > { %s1834_s26 = sadd.s32 4294967295, %s2056_s25   ;;  %p1838_p0 = scmp.ge.s32.totalorder %s2056_s25, 1  ;;  %s2056_s25 = sphi %s2132_s25, %s24_s25  }
   0x2   : > { %p427_p1 = scmp.lt.s32.totalorder %s2056_s25, 4 }
   0x4   : > { %p428_p2 = pnand %p1838_p0, %p427_p1 }
   0x5   : > { %v524_v0 = vld [vmem:[%s2536_s0] sm:$0xff] (!%p428_p2)  ;;  %v525_v1 = vld [vmem:[%s2536_s0 + $0x8] sm:$0xff] (!%p428_p2)  ;;  %v526_v2 = vld [vmem:[%s2536_s0 + $0x10] sm:$0xff] (!%p428_p2)  ;;  %p492_p3 = scmp.lt.s32.totalorder (!%p428_p2), %s1834_s26, 2  ;;  %vm604_vm0 = vcmask (!%p428_p2), 326656   ;;  %v2058_v9 = vmov (!%p428_p2), 0  }
   0x6   : > { %431 = sbr.rel (%p428_p2) target bundleno = 1254 (0x4e6), region = 68  ;;  %v698_v3 = vpack.c.bf16 (!%p428_p2), %v525_v1, %v524_v0  ;;  %v527_v4 = vld [vmem:[%s2536_s0 + $0x18] sm:$0xff] (!%p428_p2)  ;;  %v686_v5 = vld [vmem:[%s2540_s4] sm:$0xff] (!%p428_p2)  ;;  %v687_v8 = vld [vmem:[%s2540_s4 + $0x8] sm:$0xff] (!%p428_p2)  ;;  %2013 = vset.pattern.permute.xlu1 (!%p428_p2), %v2058_v9  ;;  %2012 = vset.pattern.permute.xlu0 (!%p428_p2), %v2058_v9  ;;  %vm617_vm1 = vcmask (!%p428_p2), 1043456   ;;  %s2059_s29 = smov (!%p428_p2), 64  }
   0x7   : > { %v699_v6 = vpack.c.bf16 (!%p428_p2), %v527_v4, %v526_v2  ;;  %v528_v7 = vld [vmem:[%s2536_s0 + $0x20] sm:$0xff] (!%p428_p2)  ;;  %v694_v10 = vpack.c.bf16 (!%p428_p2), %v687_v8, %v686_v5  ;;  %v545_v12 = vld [vmem:[%s2538_s2 + $0x8] sm:$0xff] (!%p428_p2)  ;;  %v558_v20 = vld [vmem:[%s2539_s3 + $0x10] sm:$0xff] (!%p428_p2)  ;;  %vm853_vm2 = vcmask (!%p428_p2), 523264   ;;  %vm1523_vm3 = vcmask (!%p428_p2), 261120  }
   0x8   : > { %1920 = vmatprep.subr.bf16.mxu1 (!%p428_p2), %v698_v3  ;;  %v544_v11 = vld [vmem:[%s2538_s2] sm:$0xff] (!%p428_p2)  ;;  %v700_v15 = vpack.c.bf16 (!%p428_p2), %v528_v7, %v528_v7  ;;  %v688_v24 = vld [vmem:[%s2540_s4 + $0x10] sm:$0xff] (!%p428_p2)  ;;  %v689_v25 = vld [vmem:[%s2540_s4 + $0x18] sm:$0xff] (!%p428_p2)  ;;  %576 = vperm.xlu1 (!%p428_p2), %2013, %v558_v20  }
   0x9   : > { %1921 = vmatpush3.bf16.msra.mxu1 (!%p428_p2), %v698_v3  ;;  %v552_v13 = vpack.c.bf16 (!%p428_p2), %v545_v12, %v544_v11  ;;  %1926 = vmatprep.mubr.msk.bf16.mxu1 (!%p428_p2), %vm604_vm0, %v694_v10  ;;  %v556_v21 = vld [vmem:[%s2539_s3] sm:$0xff] (!%p428_p2)  ;;  %v691_v29 = vld [vmem:[%s2540_s4 + $0x28] sm:$0xff] (!%p428_p2)  ;;  %v559_v30 = vld [vmem:[%s2539_s3 + $0x18] sm:$0xff] (!%p428_p2)  ;;  %v695_v32 = vpack.c.bf16 (!%p428_p2), %v689_v25, %v688_v24 }
   0xa   : > { %1922 = vmatprep.subr.bf16.mxu1 (!%p428_p2), %v699_v6  ;;  %v762_v27 = vsel (!%p428_p2), %vm617_vm1, %v700_v15, 0  ;;  %v690_v28 = vld [vmem:[%s2540_s4 + $0x20] sm:$0xff] (!%p428_p2)  ;;  %566 = vperm.xlu0 (!%p428_p2), %2012, %v556_v21   ;;  %v557_v31 = vld [vmem:[%s2539_s3 + $0x8] sm:$0xff] (!%p428_p2)  ;;  %v546_v37 = vld [vmem:[%s2538_s2 + $0x10] sm:$0xff] (!%p428_p2) }
   0xb   : > { %1912 = vmatprep.mubr.msk.bf16.mxu0 (!%p428_p2), %vm604_vm0, %v552_v13  ;;  %v696_v34 = vpack.c.bf16 (!%p428_p2), %v691_v29, %v690_v28  ;;  %v561_v35 = vld [vmem:[%s2539_s3 + $0x28] sm:$0xff] (!%p428_p2)  ;;  %v560_v36 = vld [vmem:[%s2539_s3 + $0x20] sm:$0xff] (!%p428_p2)  ;;  %v547_v38 = vld [vmem:[%s2538_s2 + $0x18] sm:$0xff] (!%p428_p2) }
   0xc   : > { %581 = vperm.xlu1 (!%p428_p2), %2013, %v559_v30   ;;  %v692_v39 = vld [vmem:[%s2540_s4 + $0x30] sm:$0xff] (!%p428_p2)  ;;  %v693_v41 = vld [vmem:[%s2540_s4 + $0x38] sm:$0xff] (!%p428_p2)  ;;  %v548_v42 = vld [vmem:[%s2538_s2 + $0x20] sm:$0xff] (!%p428_p2)  ;;  %v553_v44 = vpack.c.bf16 (!%p428_p2), %v547_v38, %v546_v37 }
   0xd   : > { %s2551_s26 = smov (!%p492_p3, %s1834_s26), 2  ;;  %1923 = vmatpush3.bf16.msra.mxu1 %v699_v6  ;;  %v549_v43 = vld [vmem:[%s2538_s2 + $0x28] sm:$0xff]  ;;  %v563_v45 = vld [vmem:[%s2539_s3 + $0x38] sm:$0xff]  ;;  %v562_v46 = vld [vmem:[%s2539_s3 + $0x30] sm:$0xff]  ;;  %v697_v47 = vpack.c.bf16 %v693_v41, %v692_v39 }
   0xe   : > { %s494_s15 = scalar_lea.vmem %s2537_s1, %s2551_s26  ;;  %1999 = vmatprep.subr.msk.bf16.mxu1 %vm617_vm1, %v700_v15  ;;  %571 = vperm.xlu0 %2012, %v557_v31   ;;  %v554_v48 = vpack.c.bf16 %v549_v43, %v548_v42  ;;  %v702_v49 = vld [vmem:[%s2541_s5 + $0x8] sm:$0xff]  ;;  %v701_v50 = vld [vmem:[%s2541_s5] sm:$0xff]  ;;  %v550_v51 = vld [vmem:[%s2538_s2 + $0x30] sm:$0xff]  ;;  %s2272_s30 = sshll.u32 %s2551_s26, 4 }
   0xf   : > { %v1849_v14 = vld [vmem:[%s494_s15] ss:$0 sm:$0xff]  ;;  %v551_v52 = vld [vmem:[%s2538_s2 + $0x38] sm:$0xff]  ;;  %v703_v55 = vld [vmem:[%s2541_s5 + $0x10] sm:$0xff]  ;;  %s508_s16 = scalar_lea.vmem %s2546_s10, %s2272_s30  ;;  %s513_s19 = scalar_lea.vmem %s2547_s11, %s2272_s30 }
  0x10   : > { %v536_v16 = vmul.f32 %v1849_v14, %v524_v0  ;;  %v537_v17 = vmul.f32 %v1849_v14, %v525_v1  ;;  %v538_v18 = vmul.f32 %v1849_v14, %v526_v2  ;;  %v539_v19 = vmul.f32 %v1849_v14, %v527_v4  ;;  %591 = vperm.xlu1 %2013, %v561_v35   ;;  %v704_v54 = vld [vmem:[%s2541_s5 + $0x18] sm:$0xff]  ;;  %v706_v56 = vld [vmem:[%s2541_s5 + $0x28] sm:$0xff]  ;;  %v705_v57 = vld [vmem:[%s2541_s5 + $0x20] sm:$0xff]  ;;  %s1839_s24 = sshll.u32 %s2551_s26, 2 }
  0x11   : > { %v540_v26 = vmul.f32 %v1849_v14, %v528_v7  ;;  %1925 = vmatpush3.bf16.msra.mxu1 %v762_v27  ;;  %v555_v53 = vpack.c.bf16 %v551_v52, %v550_v51  ;;  %v708_v58 = vld [vmem:[%s2541_s5 + $0x38] sm:$0xff]  ;;  %v707_v59 = vld [vmem:[%s2541_s5 + $0x30] sm:$0xff]  ;;  %s522_s23 = scalar_lea.vmem %s2549_s13, %s1839_s24 }
  0x12   : > { %v541_v22 = vpack.c.bf16 %v537_v17, %v536_v16  ;;  %v542_v23 = vpack.c.bf16 %v539_v19, %v538_v18  ;;  %586 = vperm.xlu0 %2012, %v560_v36  }
  0x13   : > { %v543_v33 = vpack.c.bf16 %v540_v26, %v540_v26 }
  0x14   : > { %1906 = vmatprep.subr.bf16.mxu0 %v541_v22  ;;  %1927 = vmatmul.mubr.msk.bf16.vlgmr.msra.gmra.mrb[0].mxu1 %vm604_vm0, %v695_v32 }
  0x15   : > { %1907 = vmatpush3.bf16.msra.mxu0 %v541_v22  ;;  %v619_v40 = vsel %vm617_vm1, %v543_v33, 0  ;;  %1930 = vmatprep.mubr.msk.bf16.mxu1 %vm604_vm0, %v696_v34 }
  0x16   : > { %1908 = vmatprep.subr.bf16.mxu0 %v542_v23  ;;  %601 = vperm.xlu1 %2013, %v563_v45  }
  0x17   : > { %596 = vperm.xlu0 %2012, %v562_v46  }
  0x19   : > { %1909 = vmatpush3.bf16.msra.mxu0 %v542_v23 }
  0x1a   : > { %1998 = vmatprep.subr.msk.bf16.mxu0 %vm617_vm1, %v543_v33  ;;  %716 = vperm.xlu1 %2013, %v702_v49  }
  0x1b   : > { %711 = vperm.xlu0 %2012, %v701_v50  }
  0x1c   : > { %1931 = vmatmul.mubr.msk.bf16.gmra.mrb[4].mxu1 %vm604_vm0, %v697_v47 }
  0x1d   : > { %1911 = vmatpush3.bf16.msra.mxu0 %v619_v40 }
  0x1e   : > { %726 = vperm.xlu1 %2013, %v704_v54   ;;  %v1633_v54 = vld [vmem:[%s513_s19] sm:$0xff] }
  0x1f   : > { %721 = vperm.xlu0 %2012, %v703_v55  }
  0x20   : > { %1913 = vmatmul.mubr.msk.bf16.vlgmr.msra.gmra.mrb[0].mxu0 %vm604_vm0, %v553_v44 }
  0x21   : > { %1916 = vmatprep.mubr.msk.bf16.mxu0 %vm604_vm0, %v554_v48 }
  0x22   : > { %736 = vperm.xlu1 %2013, %v706_v56  }
  0x23   : > { %731 = vperm.xlu0 %2012, %v705_v57  }
  0x26   : > { %746 = vperm.xlu1 %2013, %v708_v58  }
  0x27   : > { %741 = vperm.xlu0 %2012, %v707_v59  }
  0x28   : > { %1917 = vmatmul.mubr.msk.bf16.gmra.mrb[4].mxu0 %vm604_vm0, %v555_v53  ;;  %v1613_v53 = vld [vmem:[%s508_s16] sm:$0xff] }
  0x87   : > { %v577_v60 = vpop.permute.xlu1 %576 }
  0x89   : > { %v567_v61 = vpop.permute.xlu0 %566 }
  0x8b   : > { %v582_v62 = vpop.permute.xlu1 %581 }
  0x8d   : > { %v572_v63 = vpop.permute.xlu0 %571 }
  0x8f   : > { %v592_v0 = vpop.permute.xlu1 %591 }
  0x91   : > { %v587_v1 = vpop.permute.xlu0 %586 }
  0x95   : > { %v602_v2 = vpop.permute.xlu1 %601 }
  0x96   : > { %v597_v3 = vpop.permute.xlu0 %596 }
  0x99   : > { %v717_v4 = vpop.permute.xlu1 %716 }
  0x9a   : > { %v712_v5 = vpop.permute.xlu0 %711 }
  0x9d   : > { %v727_v6 = vpop.permute.xlu1 %726 }
  0x9e   : > { %v722_v7 = vpop.permute.xlu0 %721 }
  0xa1   : > { %v737_v8 = vpop.permute.xlu1 %736 }
  0xa2   : > { %v732_v11 = vpop.permute.xlu0 %731 }
  0xa5   : > { %v747_v20 = vpop.permute.xlu1 %746 }
  0xa6   : > { %v742_v22 = vpop.permute.xlu0 %741 }
  0xe7   : > { %v1928_v10 = vpop.f32.mrb[0].mxu1 }
  0xe8   : > { %v798_v12 = vpop.f32.mrb[1].mxu1  ;;  %v807_v14 = vadd.f32 %v1928_v10, %v722_v7  ;;  %v1028_v10 = vld [vmem:[%s2544_s8 + $0x8] sm:$0xff] }
  0xe9   : > { %v1929_v13 = vpop.f32.mrb[2].mxu1  ;;  %v799_v17 = vadd.f32 %v798_v12, %v712_v5 }
  0xea   : > { %v810_v15 = vadd.f32 %v1929_v13, %v727_v6  ;;  %v801_v16 = vpop.f32.mrb[3].mxu1  ;;  %v1027_v13 = vld [vmem:[%s2544_s8] sm:$0xff] }
  0xeb   : > { %v802_v18 = vadd.f32 %v801_v16, %v717_v4  ;;  %v1032_v16 = vld [vmem:[%s2544_s8 + $0x28] sm:$0xff] }
  0xec   : > { %v830_v19 = vpack.c.bf16 %v810_v15, %v807_v14  ;;  %v1029_v14 = vld [vmem:[%s2544_s8 + $0x10] sm:$0xff] }
  0xed   : > { %v829_v21 = vpack.c.bf16 %v802_v18, %v799_v17  ;;  %v2303_v15 = vpack.c.bf16 %v1029_v14, %v1027_v13  ;;  %v1034_v17 = vld [vmem:[%s2544_s8 + $0x38] sm:$0xff] }
  0xee   : > { %v2312_v18 = vpack.c.bf16 %v1034_v17, %v1032_v16 }
  0xef   : > { %v1932_v25 = vpop.f32.mrb[4].mxu1  ;;  %1934 = vmatprep.subr.bf16.mxu0 %v829_v21 }
  0xf0   : > { %v814_v27 = vpop.f32.mrb[5].mxu1  ;;  %1935 = vmatpush3.bf16.msra.mxu0 %v829_v21  ;;  %v823_v33 = vadd.f32 %v1932_v25, %v742_v22  ;;  %v1036_v22 = vld [vmem:[%s2544_s8 + $0x48] sm:$0xff]  ;;  %v1035_v25 = vld [vmem:[%s2544_s8 + $0x40] sm:$0xff] }
  0xf1   : > { %v1933_v31 = vpop.f32.mrb[6].mxu1  ;;  %1936 = vmatprep.subr.bf16.mxu0 %v830_v19  ;;  %v815_v38 = vadd.f32 %v814_v27, %v732_v11  ;;  %v1030_v11 = vld [vmem:[%s2544_s8 + $0x18] sm:$0xff] }
  0xf2   : > { %v826_v35 = vadd.f32 %v1933_v31, %v747_v20  ;;  %v817_v36 = vpop.f32.mrb[7].mxu1  ;;  %v1966_v12 = vpack.c.bf16 %v1030_v11, %v1028_v10  ;;  %v1033_v20 = vld [vmem:[%s2544_s8 + $0x30] sm:$0xff]  ;;  %v1039_v31 = vld [vmem:[%s2544_s8 + $0x60] sm:$0xff] }
  0xf3   : > { %v1914_v23 = vpop.f32.mrb[0].mxu0  ;;  %v818_v39 = vadd.f32 %v817_v36, %v737_v8 }
  0xf4   : > { %v655_v24 = vpop.f32.mrb[1].mxu0  ;;  %v664_v28 = vadd.f32 %v1914_v23, %v577_v60  ;;  %v832_v41 = vpack.c.bf16 %v826_v35, %v823_v33  ;;  %1937 = vmatpush3.bf16.msra.mxu0 %v830_v19  ;;  %v1614_v60 = vld [vmem:[%s508_s16 + $0x8] sm:$0x3]  ;;  %1967 = vmatprep.subr.bf16.mxu1 %v1966_v12  ;;  %v1038_v23 = vld [vmem:[%s2544_s8 + $0x58] sm:$0xff] }
  0xf5   : > { %v1915_v26 = vpop.f32.mrb[2].mxu0  ;;  %v656_v32 = vadd.f32 %v655_v24, %v567_v61  ;;  %v831_v42 = vpack.c.bf16 %v818_v39, %v815_v38  ;;  %v1634_v61 = vld [vmem:[%s513_s19 + $0x8] sm:$0x3]  ;;  %1969 = vmatpush1.bf16.msra.mxu1 %v2303_v15  ;;  %v2330_v24 = vpack.c.bf16 %v1038_v23, %v1036_v22  ;;  %s503_s19 = scalar_lea.vmem %s2545_s9, %s2272_s30 }
  0xf6   : > { %v667_v29 = vadd.f32 %v1915_v26, %v582_v62  ;;  %v658_v30 = vpop.f32.mrb[3].mxu0  ;;  %1971 = vmatprep.subr.bf16.mxu1 %v2312_v18  ;;  %v1037_v26 = vld [vmem:[%s2544_s8 + $0x50] sm:$0xff] }
  0xf7   : > { %v659_v34 = vadd.f32 %v658_v30, %v572_v63  ;;  %1938 = vmatprep.subr.bf16.mxu0 %v831_v42  ;;  %v2338_v27 = vpack.c.bf16 %v1037_v26, %v1035_v25 }
  0xf8   : > { %v834_v37 = vpack.c.bf16 %v667_v29, %v664_v28  ;;  %1939 = vmatpush3.bf16.msra.mxu0 %v831_v42  ;;  %v1040_v28 = vld [vmem:[%s2544_s8 + $0x68] sm:$0xff]  ;;  %v1042_v29 = vld [vmem:[%s2544_s8 + $0x78] sm:$0xff] }
  0xf9   : > { %v833_v40 = vpack.c.bf16 %v659_v34, %v656_v32  ;;  %1940 = vmatprep.subr.bf16.mxu0 %v832_v41  ;;  %v2348_v30 = vpack.c.bf16 %v1042_v29, %v1040_v28  ;;  %v1041_v32 = vld [vmem:[%s2544_s8 + $0x70] sm:$0xff]  ;;  %v2060_v34 = vmov 0.0  }
  0xfa   : > { %1123 = vrot.lane.b32.xlu1 %v834_v37, %s2059_s29  ;;  %v2356_v33 = vpack.c.bf16 %v1041_v32, %v1039_v31  ;;  %1110 = vmatprep.mubr.f32.mxu1 %v2060_v34 }
  0xfb   : > { %v1918_v43 = vpop.f32.mrb[4].mxu0  ;;  %1121 = vrot.lane.b32.xlu0 %v833_v40, %s2059_s29 }
  0xfc   : > { %v671_v44 = vpop.f32.mrb[5].mxu0  ;;  %v680_v46 = vadd.f32 %v1918_v43, %v597_v3  ;;  %1941 = vmatpush3.bf16.msra.mxu0 %v832_v41 }
  0xfd   : > { %v1919_v45 = vpop.f32.mrb[6].mxu0  ;;  %v672_v49 = vadd.f32 %v671_v44, %v587_v1 }
  0xfe   : > { %v683_v47 = vadd.f32 %v1919_v45, %v602_v2  ;;  %v674_v48 = vpop.f32.mrb[7].mxu0 }
  0xff   : > { %v675_v50 = vadd.f32 %v674_v48, %v592_v0  ;;  %1153 = vrot.lane.b32.xlu0 %v829_v21, %s2059_s29 }
 0x100   : > { %v836_v51 = vpack.c.bf16 %v683_v47, %v680_v46 }
 0x101   : > { %v835_v52 = vpack.c.bf16 %v675_v50, %v672_v49 }
 0x102   : > { %1127 = vrot.lane.b32.xlu1 %v836_v51, %s2059_s29 }
 0x103   : > { %1125 = vrot.lane.b32.xlu0 %v835_v52, %s2059_s29 }
 0x106   : > { %1155 = vrot.lane.b32.xlu1 %v830_v19, %s2059_s29  ;;  %v1031_v19 = vld [vmem:[%s2544_s8 + $0x20] sm:$0xff] }
 0x107   : > { %1157 = vrot.lane.b32.xlu0 %v831_v42, %s2059_s29  ;;  %v2320_v21 = vpack.c.bf16 %v1033_v20, %v1031_v19 }
 0x109   : > { %1973 = vmatpush1.bf16.msra.mxu1 %v2320_v21 }
 0x10a   : > { %1159 = vrot.lane.b32.xlu1 %v832_v41, %s2059_s29  ;;  %1975 = vmatprep.subr.bf16.mxu1 %v2330_v24  ;;  %s498_s29 = scalar_lea.vmem %s2543_s7, %s1839_s24  ;;  %s1875_s24 = sshll.u32 %s2551_s26, 6 }
 0x10d   : > { %1977 = vmatpush1.bf16.msra.mxu1 %v2338_v27 }
 0x10e   : > { %1979 = vmatprep.subr.bf16.mxu1 %v2348_v30 }
 0x111   : > { %1981 = vmatpush1.bf16.msra.mxu1 %v2356_v33 }
 0x112   : > { %1983 = vmatprep.subr.bf16.mxu1 %v1966_v12 }
 0x125   : > { %837 = vxpose.xlu0.c.b16.start [1/4] (short) (narrow) %v833_v40, 64 }
 0x129   : > { %838 = vxpose.xlu0.c.b16.cont [2/4] (short) (narrow) %v834_v37, 64 }
 0x12d   : > { %839 = vxpose.xlu0.c.b16.cont [3/4] (short) (narrow) %v835_v52, 64 }
 0x131   : > { %840 = vxpose.xlu0.c.b16.end [4/4] (short) (narrow) %v836_v51, 64 }
 0x13a   : > { %1617 = vperm.xlu0 %2012, %v1613_v53  }
 0x13e   : > { %1637 = vperm.xlu0 %2012, %v1633_v54  }
 0x16c   : > { %v1124_v56 = vpop.permute.xlu1 %1123 }
 0x16d   : > { %v1122_v55 = vpop.permute.xlu0 %1121 }
 0x16e   : > { %1133 = vxpose.xlu1.c.b16.start [1/4] (short) (narrow) %v1122_v55, 64 }
 0x171   : > { %v1154_v57 = vpop.permute.xlu0 %1153 }
 0x172   : > { %1134 = vxpose.xlu1.c.b16.cont [2/4] (short) (narrow) %v1124_v56, 64  ;;  %1950 = vmatprep.subr.bf16.mxu0 %v1154_v57 }
 0x174   : > { %v1128_v59 = vpop.permute.xlu1 %1127 }
 0x175   : > { %v1126_v58 = vpop.permute.xlu0 %1125 }
 0x176   : > { %1135 = vxpose.xlu1.c.b16.cont [3/4] (short) (narrow) %v1126_v58, 64 }
 0x178   : > { %v1156_v1 = vpop.permute.xlu1 %1155 }
 0x179   : > { %v1158_v62 = vpop.permute.xlu0 %1157 }
 0x17a   : > { %1136 = vxpose.xlu1.c.b16.end [4/4] (short) (narrow) %v1128_v59, 64 }
 0x17c   : > { %v1160_v4 = vpop.permute.xlu1 %1159 }
 0x17e   : > { %1622 = vperm.xlu1 %2013, %v1614_v60  }
 0x182   : > { %1642 = vperm.xlu1 %2013, %v1634_v61  }
 0x18b   : > { %v845_v63 = vpop.trf.xlu0 }
 0x18c   : > { %1942 = vmatprep.mubr.msk.bf16.mxu0 %vm853_vm2, %v845_v63 }
 0x18f   : > { %v846_v0 = vpop.trf.xlu0 }
 0x190   : > { %1943 = vmatmul.mubr.msk.bf16.vlgmr.msra.gmra.mrb[8].mxu0 %vm853_vm2, %v846_v0 }
 0x191   : > { %1951 = vmatpush3.bf16.msra.mxu0 %v1154_v57 }
 0x192   : > { %1952 = vmatprep.subr.bf16.mxu0 %v1156_v1 }
 0x193   : > { %v847_v2 = vpop.trf.xlu0 }
 0x194   : > { %1946 = vmatprep.mubr.msk.bf16.mxu0 %vm853_vm2, %v847_v2 }
 0x195   : > { %1953 = vmatpush3.bf16.msra.mxu0 %v1156_v1 }
 0x196   : > { %1954 = vmatprep.subr.bf16.mxu0 %v1158_v62 }
 0x197   : > { %v848_v3 = vpop.trf.xlu0 }
 0x198   : > { %1947 = vmatmul.mubr.msk.bf16.gmra.mrb[12].mxu0 %vm853_vm2, %v848_v3 }
 0x199   : > { %1955 = vmatpush3.bf16.msra.mxu0 %v1158_v62 }
 0x19a   : > { %1956 = vmatprep.subr.bf16.mxu0 %v1160_v4 }
 0x19d   : > { %1957 = vmatpush3.bf16.msra.mxu0 %v1160_v4 }
 0x1d4   : > { %v1141_v5 = vpop.trf.xlu1 }
 0x1d5   : > { %1958 = vmatprep.mubr.msk.bf16.mxu0 %vm853_vm2, %v1141_v5 }
 0x1d8   : > { %v1142_v6 = vpop.trf.xlu1 }
 0x1d9   : > { %1959 = vmatmul.mubr.msk.bf16.vlgmr.msra.gmra.mrb[16].mxu0 %vm853_vm2, %v1142_v6 }
 0x1dc   : > { %v1143_v7 = vpop.trf.xlu1 }
 0x1dd   : > { %1962 = vmatprep.mubr.msk.bf16.mxu0 %vm853_vm2, %v1143_v7 }
 0x1e0   : > { %v1144_v8 = vpop.trf.xlu1 }
 0x1e1   : > { %1963 = vmatmul.mubr.msk.bf16.gmra.mrb[20].mxu0 %vm853_vm2, %v1144_v8 }
 0x1e2   : > { %1602 = vmatprep.mubr.bf16.mxu0 %v2058_v9 }
 0x263   : > { %v1944_v35 = vpop.f32.mrb[8].mxu0 }
 0x264   : > { %v900_v36 = vpop.f32.mrb[9].mxu0  ;;  %v933_v39 = vsel %vm853_vm2, %v1944_v35, -inf }
 0x265   : > { %v1945_v37 = vpop.f32.mrb[10].mxu0  ;;  %v931_v40 = vsel %vm853_vm2, %v900_v36, -inf }
 0x266   : > { %v903_v38 = vpop.f32.mrb[11].mxu0  ;;  %v934_v42 = vsel %vm853_vm2, %v1945_v37, -inf }
 0x267   : > { %v932_v45 = vsel %vm853_vm2, %v903_v38, -inf }
 0x26b   : > { %v1948_v41 = vpop.f32.mrb[12].mxu0 }
 0x26c   : > { %v939_v43 = vsel %vm853_vm2, %v1948_v41, -inf  ;;  %v916_v44 = vpop.f32.mrb[13].mxu0 }
 0x26d   : > { %v940_v46 = vmax.f32 %v933_v39, %v939_v43  ;;  %v935_v47 = vsel %vm853_vm2, %v916_v44, -inf  ;;  %v1949_v48 = vpop.f32.mrb[14].mxu0 }
 0x26e   : > { %v936_v49 = vmax.f32 %v931_v40, %v935_v47  ;;  %v941_v50 = vsel %vm853_vm2, %v1949_v48, -inf  ;;  %v919_v51 = vpop.f32.mrb[15].mxu0 }
 0x26f   : > { %v942_v52 = vmax.f32 %v934_v42, %v941_v50  ;;  %v937_v53 = vsel %vm853_vm2, %v919_v51, -inf }
 0x270   : > { %v938_v54 = vmax.f32 %v932_v45, %v937_v53 }
 0x271   : > { %v944_v55 = vmax.f32 %v940_v46, %v942_v52 }
 0x272   : > { %v943_v56 = vmax.f32 %v936_v49, %v938_v54 }
 0x274   : > { %v945_v57 = vmax.f32 %v943_v56, %v944_v55 }
 0x276   : > { %v946_v58 = vrot.slane %v945_v57, 4 }
 0x278   : > { %v947_v59 = vmax.f32 %v945_v57, %v946_v58 }
 0x27a   : > { %v948_v60 = vrot.slane %v947_v59, 2 }
 0x27c   : > { %v949_v61 = vmax.f32 %v947_v59, %v948_v60 }
 0x27e   : > { %v950_v62 = vrot.slane %v949_v61, 1 }
 0x280   : > { %v951_v63 = vmax.f32 %v949_v61, %v950_v62 }
 0x282   : > { %v952_v0 = vsub.f32 %v900_v36, %v951_v63  ;;  %v953_v1 = vsub.f32 %v903_v38, %v951_v63  ;;  %v954_v2 = vsub.f32 %v1944_v35, %v951_v63  ;;  %v955_v3 = vsub.f32 %v1945_v37, %v951_v63 }
 0x283   : > { %v956_v4 = vsub.f32 %v916_v44, %v951_v63  ;;  %v957_v5 = vsub.f32 %v919_v51, %v951_v63  ;;  %v958_v6 = vsub.f32 %v1948_v41, %v951_v63  ;;  %v959_v7 = vsub.f32 %v1949_v48, %v951_v63 }
 0x284   : > { %v960_v8 = vmul.f32 1.442695, %v952_v0  ;;  %v962_v10 = vmul.f32 1.442695, %v953_v1  ;;  %v964_v11 = vmul.f32 1.442695, %v954_v2 }
 0x285   : > { %v966_v12 = vmul.f32 1.442695, %v955_v3  ;;  %v968_v13 = vmul.f32 1.442695, %v956_v4  ;;  %v970_v14 = vmul.f32 1.442695, %v957_v5 }
 0x286   : > { %2014 = vpow2.f32 %v960_v8  ;;  %v972_v16 = vmul.f32 1.442695, %v958_v6  ;;  %v974_v17 = vmul.f32 1.442695, %v959_v7 }
 0x287   : > { %2016 = vpow2.f32 %v962_v10 }
 0x288   : > { %2018 = vpow2.f32 %v964_v11 }
 0x289   : > { %2020 = vpow2.f32 %v966_v12 }
 0x28a   : > { %2022 = vpow2.f32 %v968_v13 }
 0x28b   : > { %2024 = vpow2.f32 %v970_v14 }
 0x28c   : > { %2026 = vpow2.f32 %v972_v16 }
 0x28d   : > { %2028 = vpow2.f32 %v974_v17 }
 0x290   : > { %v2015_v19 = vpop.eup %2014 }
 0x291   : > { %v2017_v20 = vpop.eup %2016  ;;  %v976_v22 = vsel %vm853_vm2, %v2015_v19, 0.0 }
 0x292   : > { %v2019_v23 = vpop.eup %2018  ;;  %v977_v25 = vsel %vm853_vm2, %v2017_v20, 0.0 }
 0x293   : > { %v2021_v26 = vpop.eup %2020  ;;  %v978_v28 = vadd.f32 %v977_v25, %v976_v22  ;;  %v979_v29 = vsel %vm853_vm2, %v2019_v23, 0.0 }
 0x294   : > { %v2023_v31 = vpop.eup %2022  ;;  %v981_v32 = vsel %vm853_vm2, %v2021_v26, 0.0 }
 0x295   : > { %v2025_v35 = vpop.eup %2024  ;;  %v980_v36 = vadd.f32 %v979_v29, %v978_v28  ;;  %v983_v37 = vsel %vm853_vm2, %v2023_v31, 0.0 }
 0x296   : > { %v2027_v38 = vpop.eup %2026  ;;  %v985_v40 = vsel %vm853_vm2, %v2025_v35, 0.0 }
 0x297   : > { %v982_v39 = vadd.f32 %v981_v32, %v980_v36  ;;  %v2029_v41 = vpop.eup %2028  ;;  %v987_v43 = vsel %vm853_vm2, %v2027_v38, 0.0 }
 0x298   : > { %v989_v45 = vsel %vm853_vm2, %v2029_v41, 0.0 }
 0x299   : > { %v984_v42 = vadd.f32 %v983_v37, %v982_v39 }
 0x29b   : > { %v986_v44 = vadd.f32 %v985_v40, %v984_v42 }
 0x29d   : > { %v988_v46 = vadd.f32 %v987_v43, %v986_v44 }
 0x29f   : > { %v990_v47 = vadd.f32 %v989_v45, %v988_v46 }
 0x2a1   : > { %v991_v48 = vrot.slane %v990_v47, 4 }
 0x2a3   : > { %v992_v49 = vadd.f32 %v991_v48, %v990_v47 }
 0x2a5   : > { %v993_v50 = vrot.slane %v992_v49, 2 }
 0x2a7   : > { %v994_v51 = vadd.f32 %v993_v50, %v992_v49 }
 0x2a9   : > { %v995_v52 = vrot.slane %v994_v51, 1 }
 0x2ab   : > { %v996_v53 = vadd.f32 %v995_v52, %v994_v51 }
 0x2ac   : > { %v2377_v54 = vpop.f32.mrb[16].mxu0 }
 0x2ad   : > { %2030 = vrcp.f32 %v996_v53  ;;  %v2379_v55 = vpop.f32.mrb[17].mxu0  ;;  %v1244_v59 = vsel %vm853_vm2, %v2377_v54, -inf }
 0x2ae   : > { %v2381_v56 = vpop.f32.mrb[18].mxu0  ;;  %v1242_v62 = vsel %vm853_vm2, %v2379_v55, -inf }
 0x2af   : > { %v1214_v57 = vpop.f32.mrb[19].mxu0  ;;  %v1245_v25 = vsel %vm853_vm2, %v2381_v56, -inf }
 0x2b0   : > { %v1243_v29 = vsel %vm853_vm2, %v1214_v57, -inf }
 0x2b4   : > { %v2383_v58 = vpop.f32.mrb[20].mxu0 }
 0x2b5   : > { %v1250_v60 = vsel %vm853_vm2, %v2383_v58, -inf  ;;  %v2389_v61 = vpop.f32.mrb[21].mxu0 }
 0x2b6   : > { %v1251_v63 = vmax.f32 %v1244_v59, %v1250_v60  ;;  %v1246_v0 = vsel %vm853_vm2, %v2389_v61, -inf  ;;  %v2395_v1 = vpop.f32.mrb[22].mxu0 }
 0x2b7   : > { %v2031_v2 = vpop.eup %2030  ;;  %v1247_v3 = vmax.f32 %v1242_v62, %v1246_v0  ;;  %v1252_v4 = vsel %vm853_vm2, %v2395_v1, -inf  ;;  %v1230_v5 = vpop.f32.mrb[23].mxu0 }
 0x2b8   : > { %v998_v6 = vmul.f32 %v2031_v2, %v2015_v19  ;;  %v999_v7 = vmul.f32 %v2031_v2, %v2017_v20  ;;  %v1000_v8 = vmul.f32 %v2031_v2, %v2019_v23  ;;  %v1001_v10 = vmul.f32 %v2031_v2, %v2021_v26 }
 0x2b9   : > { %v1002_v11 = vmul.f32 %v2031_v2, %v2023_v31  ;;  %v1003_v12 = vmul.f32 %v2031_v2, %v2025_v35  ;;  %v1004_v13 = vmul.f32 %v2031_v2, %v2027_v38  ;;  %v1005_v14 = vmul.f32 %v2031_v2, %v2029_v41 }
 0x2ba   : > { %v1006_v16 = vsel %vm853_vm2, %v998_v6, 0.0  ;;  %v1007_v17 = vsel %vm853_vm2, %v999_v7, 0.0  ;;  %v1009_v28 = vsel %vm853_vm2, %v1000_v8, 0.0  ;;  %v1253_v19 = vmax.f32 %v1245_v25, %v1252_v4 }
 0x2bb   : > { %v1008_v22 = vadd.f32 %v1007_v17, %v1006_v16  ;;  %v1248_v20 = vsel %vm853_vm2, %v1230_v5, -inf  ;;  %v1011_v31 = vsel %vm853_vm2, %v1001_v10, 0.0  ;;  %v1013_v37 = vsel %vm853_vm2, %v1002_v11, 0.0 }
 0x2bc   : > { %v1249_v26 = vmax.f32 %v1243_v29, %v1248_v20  ;;  %v1255_v32 = vmax.f32 %v1251_v63, %v1253_v19  ;;  %v1015_v40 = vsel %vm853_vm2, %v1003_v12, 0.0  ;;  %v1017_v43 = vsel %vm853_vm2, %v1004_v13, 0.0 }
 0x2bd   : > { %v1010_v23 = vadd.f32 %v1009_v28, %v1008_v22  ;;  %v1019_v46 = vsel %vm853_vm2, %v1005_v14, 0.0 }
 0x2be   : > { %v1254_v36 = vmax.f32 %v1247_v3, %v1249_v26 }
 0x2bf   : > { %v1012_v35 = vadd.f32 %v1011_v31, %v1010_v23 }
 0x2c0   : > { %v1256_v39 = vmax.f32 %v1254_v36, %v1255_v32 }
 0x2c1   : > { %v1014_v38 = vadd.f32 %v1013_v37, %v1012_v35 }
 0x2c2   : > { %v1257_v42 = vrot.slane %v1256_v39, 4 }
 0x2c3   : > { %v1016_v41 = vadd.f32 %v1015_v40, %v1014_v38 }
 0x2c4   : > { %v1258_v45 = vmax.f32 %v1256_v39, %v1257_v42 }
 0x2c5   : > { %v1018_v44 = vadd.f32 %v1017_v43, %v1016_v41 }
 0x2c6   : > { %v1259_v48 = vrot.slane %v1258_v45, 2 }
 0x2c7   : > { %v1020_v47 = vadd.f32 %v1019_v46, %v1018_v44 }
 0x2c8   : > { %v1260_v50 = vmax.f32 %v1258_v45, %v1259_v48 }
 0x2c9   : > { %v1021_v49 = vrot.slane %v1020_v47, 4 }
 0x2ca   : > { %v1261_v51 = vrot.slane %v1260_v50, 1 }
 0x2cb   : > { %v1022_v52 = vadd.f32 %v1021_v49, %v1020_v47 }
 0x2cc   : > { %v1262_v53 = vmax.f32 %v1260_v50, %v1261_v51 }
 0x2cd   : > { %v1023_v59 = vrot.slane %v1022_v52, 2 }
 0x2ce   : > { %v1263_v60 = vsub.f32 %v2379_v55, %v1262_v53  ;;  %v1264_v62 = vsub.f32 %v1214_v57, %v1262_v53  ;;  %v1265_v63 = vsub.f32 %v2377_v54, %v1262_v53  ;;  %v1266_v0 = vsub.f32 %v2381_v56, %v1262_v53 }
 0x2cf   : > { %v1267_v2 = vsub.f32 %v2389_v61, %v1262_v53  ;;  %v1268_v3 = vsub.f32 %v1230_v5, %v1262_v53  ;;  %v1269_v4 = vsub.f32 %v2383_v58, %v1262_v53  ;;  %v1270_v6 = vsub.f32 %v2395_v1, %v1262_v53 }
 0x2d0   : > { %v1271_v7 = vmul.f32 1.442695, %v1263_v60  ;;  %v1273_v8 = vmul.f32 1.442695, %v1264_v62  ;;  %v1275_v10 = vmul.f32 1.442695, %v1265_v63  ;;  %v1024_v11 = vadd.f32 %v1023_v59, %v1022_v52 }
 0x2d1   : > { %v1277_v12 = vmul.f32 1.442695, %v1266_v0  ;;  %v1279_v55 = vmul.f32 1.442695, %v1267_v2  ;;  %v1281_v56 = vmul.f32 1.442695, %v1268_v3 }
 0x2d2   : > { %2032 = vpow2.f32 %v1271_v7  ;;  %v1025_v13 = vrot.slane %v1024_v11, 1  ;;  %v1283_v57 = vmul.f32 1.442695, %v1269_v4  ;;  %v1285_v58 = vmul.f32 1.442695, %v1270_v6 }
 0x2d3   : > { %2034 = vpow2.f32 %v1273_v8 }
 0x2d4   : > { %2036 = vpow2.f32 %v1275_v10  ;;  %v1026_v54 = vadd.f32 %v1025_v13, %v1024_v11 }
 0x2d5   : > { %2038 = vpow2.f32 %v1277_v12 }
 0x2d6   : > { %1862 = vmatmul.mubr.msk.f32.vlgmr.msra.gmra.mrb[8].mxu1 %vm853_vm2, %v1026_v54  ;;  %2040 = vpow2.f32 %v1279_v55  ;;  %v1414_v54 = vlaneseq }
 0x2d7   : > { %1985 = vmatpush1.bf16.msra.mxu1 %v2303_v15  ;;  %1405 = vmatprep.mubr.f32.mxu1 %v2060_v34  ;;  %2042 = vpow2.f32 %v1281_v56 }
 0x2d8   : > { %1987 = vmatprep.subr.bf16.mxu1 %v2312_v18  ;;  %2044 = vpow2.f32 %v1283_v57  ;;  %v1415_v56 = vshrl.u32 %v1414_v54, 7  ;;  %v1412_v57 = vld [vmem:[%s498_s29] sm:$0xf]  ;;  %vm1700_vm4 = vcmp.lt.s32.totalorder %v1414_v54, 512  ;;  %s2523_s29 = scalar_lea.vmem %s2548_s12, %s1875_s24 }
 0x2d9   : > { %2046 = vpow2.f32 %v1285_v58 }
 0x2da   : > { %v2451_v58 = vsub.s32 0, %v1415_v56 }
 0x2db   : > { %1989 = vmatpush1.bf16.msra.mxu1 %v2320_v21 }
 0x2dc   : > { %v2033_v61 = vpop.eup %2032  ;;  %1991 = vmatprep.subr.bf16.mxu1 %v2330_v24 }
 0x2dd   : > { %v2035_v1 = vpop.eup %2034  ;;  %v1287_v5 = vsel %vm853_vm2, %v2033_v61, 0.0 }
 0x2de   : > { %v2037_v14 = vpop.eup %2036  ;;  %v1288_v16 = vsel %vm853_vm2, %v2035_v1, 0.0 }
 0x2df   : > { %v2039_v15 = vpop.eup %2038  ;;  %v1289_v17 = vadd.f32 %v1288_v16, %v1287_v5  ;;  %1993 = vmatpush1.bf16.msra.mxu1 %v2338_v27  ;;  %v1290_v18 = vsel %vm853_vm2, %v2037_v14, 0.0  ;;  %v1417_v5 = vrot.slane %v1412_v57, %v2451_v58 }
 0x2e0   : > { %1995 = vmatprep.subr.bf16.mxu1 %v2348_v30  ;;  %v2041_v34 = vpop.eup %2040  ;;  %v1292_v22 = vsel %vm853_vm2, %v2039_v15, 0.0 }
 0x2e1   : > { %v1291_v21 = vadd.f32 %v1290_v18, %v1289_v17  ;;  %v2043_v24 = vpop.eup %2042  ;;  %v1294_v28 = vsel %vm853_vm2, %v2041_v34, 0.0 }
 0x2e2   : > { %v2045_v29 = vpop.eup %2044  ;;  %v1296_v20 = vsel %vm853_vm2, %v2043_v24, 0.0 }
 0x2e3   : > { %v1293_v25 = vadd.f32 %v1292_v22, %v1291_v21  ;;  %1997 = vmatpush1.bf16.msra.mxu1 %v2356_v33  ;;  %v2047_v23 = vpop.eup %2046  ;;  %v1298_v26 = vsel %vm853_vm2, %v2045_v29, 0.0 }
 0x2e4   : > { %v1300_v30 = vsel %vm853_vm2, %v2047_v23, 0.0 }
 0x2e5   : > { %v1295_v19 = vadd.f32 %v1294_v28, %v1293_v25  ;;  %v1468_v25 = vld [vmem:[%s2542_s6 + $0x20] sm:$0xff] }
 0x2e7   : > { %v1297_v27 = vadd.f32 %v1296_v20, %v1295_v19  ;;  %v1469_v19 = vld [vmem:[%s2542_s6 + $0x28] sm:$0xff] }
 0x2e8   : > { %v1473_v20 = vld [vmem:[%s2542_s6 + $0x48] sm:$0xff] }
 0x2e9   : > { %v1299_v31 = vadd.f32 %v1298_v26, %v1297_v27  ;;  %v1477_v26 = vld [vmem:[%s2542_s6 + $0x68] sm:$0xff] }
 0x2eb   : > { %v1301_v32 = vadd.f32 %v1300_v30, %v1299_v31 }
 0x2ed   : > { %v1302_v35 = vrot.slane %v1301_v32, 4 }
 0x2ef   : > { %v1303_v36 = vadd.f32 %v1302_v35, %v1301_v32 }
 0x2f1   : > { %v1304_v37 = vrot.slane %v1303_v36, 2 }
 0x2f3   : > { %v1305_v38 = vadd.f32 %v1304_v37, %v1303_v36  ;;  %v1472_v37 = vld [vmem:[%s2542_s6 + $0x40] sm:$0xff] }
 0x2f5   : > { %v1306_v39 = vrot.slane %v1305_v38, 1 }
 0x2f7   : > { %v1307_v33 = vadd.f32 %v1306_v39, %v1305_v38  ;;  %v1476_v38 = vld [vmem:[%s2542_s6 + $0x60] sm:$0xff] }
 0x2f9   : > { %2048 = vrcp.f32 %v1307_v33 }
 0x303   : > { %v2049_v40 = vpop.eup %2048 }
 0x304   : > { %v1309_v41 = vmul.f32 %v2049_v40, %v2033_v61  ;;  %v1310_v42 = vmul.f32 %v2049_v40, %v2035_v1  ;;  %v1311_v43 = vmul.f32 %v2049_v40, %v2037_v14  ;;  %v1312_v44 = vmul.f32 %v2049_v40, %v2039_v15 }
 0x305   : > { %v1313_v45 = vmul.f32 %v2049_v40, %v2041_v34  ;;  %v1314_v46 = vmul.f32 %v2049_v40, %v2043_v24  ;;  %v1315_v47 = vmul.f32 %v2049_v40, %v2045_v29  ;;  %v1316_v48 = vmul.f32 %v2049_v40, %v2047_v23  ;;  %v1464_v24 = vld [vmem:[%s2542_s6] sm:$0xff]  ;;  %v1465_v29 = vld [vmem:[%s2542_s6 + $0x8] sm:$0xff] }
 0x306   : > { %v1317_v49 = vsel %vm853_vm2, %v1309_v41, 0.0  ;;  %v1318_v50 = vsel %vm853_vm2, %v1310_v42, 0.0  ;;  %v1320_v52 = vsel %vm853_vm2, %v1311_v43, 0.0  ;;  %v1322_v59 = vsel %vm853_vm2, %v1312_v44, 0.0  ;;  %v1520_v44 = vld [vmem:[%s503_s19] sm:$0xff] }
 0x307   : > { %v1319_v51 = vadd.f32 %v1318_v50, %v1317_v49  ;;  %v1324_v62 = vsel %vm853_vm2, %v1313_v45, 0.0  ;;  %v1326_v0 = vsel %vm853_vm2, %v1314_v46, 0.0  ;;  %v1328_v3 = vsel %vm853_vm2, %v1315_v47, 0.0  ;;  %v1521_v45 = vld [vmem:[%s503_s19 + $0x8] sm:$0x3] }
 0x308   : > { %v1330_v6 = vsel %vm853_vm2, %v1316_v48, 0.0  ;;  %v1420_v61 = vsub.s32 1, %v1415_v56  ;;  %v1438_v1 = vsub.f32 1.0, %v1412_v57  ;;  %v1522_v47 = vpack.c.bf16 %v1521_v45, %v1520_v44 }
 0x309   : > { %v1321_v53 = vadd.f32 %v1320_v52, %v1319_v51  ;;  %v1424_v48 = vsub.s32 2, %v1415_v56  ;;  %v1428_v49 = vsub.s32 3, %v1415_v56  ;;  %v2061_v50 = vmov 1966171168  }
 0x30a   : > { %v1421_v14 = vrot.slane %v1412_v57, %v1420_v61  ;;  %v1443_v16 = vrot.slane %v1438_v1, %v2451_v58  ;;  %v1447_v15 = vrot.slane %v1438_v1, %v1420_v61  ;;  %v1676_v51 = vunpack.c.l.s4 %v2061_v50  ;;  %v1479_v61 = vld [vmem:[%s2542_s6 + $0x78] sm:$0xff] }
 0x30b   : > { %v1323_v60 = vadd.f32 %v1322_v59, %v1321_v53  ;;  %v1425_v52 = vrot.slane %v1412_v57, %v1424_v48  ;;  %v1429_v53 = vrot.slane %v1412_v57, %v1428_v49 }
 0x30c   : > { %v1677_v59 = vunpack.c.0.s8 %v1676_v51 }
 0x30d   : > { %v1325_v63 = vadd.f32 %v1324_v62, %v1323_v60  ;;  %v1451_v60 = vrot.slane %v1438_v1, %v1424_v48 }
 0x30f   : > { %v1327_v2 = vadd.f32 %v1326_v0, %v1325_v63  ;;  %v1455_v63 = vrot.slane %v1438_v1, %v1428_v49 }
 0x311   : > { %v1329_v4 = vadd.f32 %v1328_v3, %v1327_v2 }
 0x313   : > { %v1331_v7 = vadd.f32 %v1330_v6, %v1329_v4  ;;  %v1680_v4 = vsub.s32 %v1677_v59, %v1415_v56 }
 0x315   : > { %v1332_v8 = vrot.slane %v1331_v7, 4 }
 0x317   : > { %v1333_v10 = vadd.f32 %v1332_v8, %v1331_v7  ;;  %v1466_v8 = vld [vmem:[%s2542_s6 + $0x10] sm:$0xff] }
 0x319   : > { %v1334_v11 = vrot.slane %v1333_v10, 2 }
 0x31b   : > { %v1335_v12 = vadd.f32 %v1334_v11, %v1333_v10  ;;  %v1470_v10 = vld [vmem:[%s2542_s6 + $0x30] sm:$0xff] }
 0x31d   : > { %v1336_v13 = vrot.slane %v1335_v12, 1 }
 0x31f   : > { %v1337_v55 = vadd.f32 %v1336_v13, %v1335_v12  ;;  %v1467_v12 = vld [vmem:[%s2542_s6 + $0x18] sm:$0xff] }
 0x320   : > { %v1471_v13 = vld [vmem:[%s2542_s6 + $0x38] sm:$0xff] }
 0x321   : > { %1867 = vmatmul.mubr.msk.f32.vlgmr.msra.gmra.mrb[10].mxu1 %vm853_vm2, %v1337_v55  ;;  %v1475_v55 = vld [vmem:[%s2542_s6 + $0x58] sm:$0xff] }
 0x322   : > { %1559 = vmatprep.mubr.bf16.mxu1 %v2058_v9 }
 0x3a9   : > { %v1112_v9 = vpop.f32.mrb[8].mxu1 }
 0x3aa   : > { %v1434_v17 = vmul.f32 %v1417_v5, %v1112_v9  ;;  %v1114_v18 = vpop.f32.mrb[9].mxu1 }
 0x3ab   : > { %v1435_v34 = vmul.f32 %v1421_v14, %v1114_v18  ;;  %v1474_v18 = vld [vmem:[%s2542_s6 + $0x50] sm:$0xff] }
 0x3ac   : > { %v1460_v21 = vmul.f32 %v1443_v16, %v1434_v17 }
 0x3ad   : > { %v1461_v22 = vmul.f32 %v1447_v15, %v1435_v34 }
 0x3ae   : > { %v1483_v28 = vrot.slane %v1460_v21, %v2451_v58 }
 0x3af   : > { %v1487_v23 = vrot.slane %v1461_v22, %v2451_v58  ;;  %v1673_v27 = vcombine.low %v1460_v21, %v1461_v22 }
 0x3b0   : > { %v1496_v31 = vmul.f32 %v1483_v28, %v1464_v24  ;;  %v1500_v30 = vmul.f32 %v1483_v28, %v1468_v25  ;;  %v1504_v41 = vmul.f32 %v1483_v28, %v1472_v37  ;;  %v1508_v42 = vmul.f32 %v1483_v28, %v1476_v38 }
 0x3b1   : > { %v1497_v32 = vmul.f32 %v1487_v23, %v1465_v29  ;;  %v1501_v35 = vmul.f32 %v1487_v23, %v1469_v19  ;;  %v1505_v36 = vmul.f32 %v1487_v23, %v1473_v20  ;;  %v1509_v39 = vmul.f32 %v1487_v23, %v1477_v26  ;;  %v1618_v23 = vpop.permute.xlu0 %1617 }
 0x3b2   : > { %v1512_v40 = vpack.c.bf16 %v1500_v30, %v1496_v31  ;;  %v1516_v46 = vpack.c.bf16 %v1508_v42, %v1504_v41  ;;  %v1681_v1 = vrot.slane %v1673_v27, %v1680_v4  ;;  %v1623_v27 = vpop.permute.xlu1 %1622 }
 0x3b3   : > { %v1513_v33 = vpack.c.bf16 %v1501_v35, %v1497_v32  ;;  %v1517_v43 = vpack.c.bf16 %v1509_v39, %v1505_v36 }
 0x3b5   : > { %1527 = vmatprep.subr.bf16.mxu1 %v1513_v33  ;;  %v1638_v30 = vpop.permute.xlu0 %1637 }
 0x3b6   : > { %1528 = vmatpush1.bf16.msra.mxu1 %v1512_v40  ;;  %v1643_v39 = vpop.permute.xlu1 %1642 }
 0x3b7   : > { %1529 = vmatprep.subr.bf16.mxu1 %v1517_v43 }
 0x3ba   : > { %1530 = vmatpush1.bf16.msra.mxu1 %v1516_v46 }
 0x3bd   : > { %1868 = vmatmul.mubr.msk.bf16.vlgmr.msra.gmra.mrb[12].mxu1 %vm1523_vm3, %v1522_v47 }
 0x3f4   : > { %v1407_v62 = vpop.f32.mrb[10].mxu1 }
 0x3f5   : > { %v1436_v0 = vmul.f32 %v1425_v52, %v1407_v62  ;;  %v1409_v2 = vpop.f32.mrb[11].mxu1 }
 0x3f6   : > { %v1437_v3 = vmul.f32 %v1429_v53, %v1409_v2 }
 0x3f7   : > { %v1462_v6 = vmul.f32 %v1451_v60, %v1436_v0 }
 0x3f8   : > { %v1463_v7 = vmul.f32 %v1455_v63, %v1437_v3 }
 0x3f9   : > { %v1491_v11 = vrot.slane %v1462_v6, %v2451_v58 }
 0x3fa   : > { %v1495_v56 = vrot.slane %v1463_v7, %v2451_v58  ;;  %v1674_v57 = vcombine.low %v1462_v6, %v1463_v7  ;;  %v1478_v58 = vld [vmem:[%s2542_s6 + $0x70] sm:$0xff] }
 0x3fb   : > { %v1498_v5 = vmul.f32 %v1491_v11, %v1466_v8  ;;  %v1502_v14 = vmul.f32 %v1491_v11, %v1470_v10  ;;  %v1506_v25 = vmul.f32 %v1491_v11, %v1474_v18  ;;  %v1510_v28 = vmul.f32 %v1491_v11, %v1478_v58 }
 0x3fc   : > { %v1688_v16 = vrot.slane %v1674_v57, %v1680_v4  ;;  %v1499_v9 = vmul.f32 %v1495_v56, %v1467_v12  ;;  %v1503_v15 = vmul.f32 %v1495_v56, %v1471_v13  ;;  %v1507_v17 = vmul.f32 %v1495_v56, %v1475_v55 }
 0x3fd   : > { %v1511_v34 = vmul.f32 %v1495_v56, %v1479_v61  ;;  %v1514_v24 = vpack.c.bf16 %v1502_v14, %v1498_v5  ;;  %v1518_v20 = vpack.c.bf16 %v1510_v28, %v1506_v25 }
 0x3fe   : > { %v1689_v21 = vcombine.low %v1681_v1, %v1688_v16  ;;  %v1515_v22 = vpack.c.bf16 %v1503_v15, %v1499_v9 }
 0x3ff   : > { %v1519_v19 = vpack.c.bf16 %v1511_v34, %v1507_v17 }
 0x400   : > { %v1696_v29 = vrot.slane %v1689_v21, %v1680_v4  ;;  %1570 = vmatprep.subr.bf16.mxu0 %v1515_v22 }
 0x401   : > { %1571 = vmatpush1.bf16.msra.mxu0 %v1514_v24 }
 0x402   : > { %1702 = vst.msk [vmem:[%s522_s23] sm:$0xf] %vm1700_vm4, %v1696_v29  ;;  %1572 = vmatprep.subr.bf16.mxu0 %v1519_v19 }
 0x405   : > { %1573 = vmatpush1.bf16.msra.mxu0 %v1518_v20 }
 0x408   : > { %1869 = vmatmul.mubr.msk.bf16.vlgmr.msra.gmra.mrb[24].mxu0 %vm1523_vm3, %v1522_v47 }
 0x490   : > { %v1561_v26 = vpop.f32.mrb[12].mxu1 }
 0x491   : > { %v1625_v31 = vmul.f32 %v1618_v23, %v1561_v26  ;;  %v1563_v54 = vpop.f32.mrb[13].mxu1 }
 0x492   : > { %v1626_v32 = vmul.f32 %v1618_v23, %v1563_v54  ;;  %v1565_v35 = vpop.f32.mrb[14].mxu1 }
 0x493   : > { %v1645_v36 = vadd.f32 %v1638_v30, %v1625_v31  ;;  %v1629_v37 = vmul.f32 %v1623_v27, %v1565_v35  ;;  %v1567_v38 = vpop.f32.mrb[15].mxu1 }
 0x494   : > { %v1646_v33 = vadd.f32 %v1638_v30, %v1626_v32  ;;  %v1630_v40 = vmul.f32 %v1623_v27, %v1567_v38 }
 0x495   : > { %v1653_v41 = vmax.f32 %v1645_v36, 0.0  ;;  %v1649_v42 = vadd.f32 %v1643_v39, %v1629_v37 }
 0x496   : > { %v1654_v43 = vmax.f32 %v1646_v33, 0.0  ;;  %v1650_v44 = vadd.f32 %v1643_v39, %v1630_v40 }
 0x497   : > { %1661 = vst [vmem:[%s2523_s29] sm:$0xff] %v1653_v41  ;;  %v1657_v45 = vmax.f32 %v1649_v42, 0.0 }
 0x498   : > { %1662 = vst [vmem:[%s2523_s29 + $0x8] sm:$0xff] %v1654_v43  ;;  %v1658_v46 = vmax.f32 %v1650_v44, 0.0 }
 0x499   : > { %1665 = vst [vmem:[%s2523_s29 + $0x20] sm:$0x3] %v1657_v45 }
 0x49a   : > { %1666 = vst [vmem:[%s2523_s29 + $0x28] sm:$0x3] %v1658_v46 }
 0x4db   : > { %v1604_v47 = vpop.f32.mrb[24].mxu0 }
 0x4dc   : > { %v1627_v48 = vmul.f32 %v1618_v23, %v1604_v47  ;;  %v1606_v49 = vpop.f32.mrb[25].mxu0 }
 0x4dd   : > { %v1628_v50 = vmul.f32 %v1618_v23, %v1606_v49  ;;  %v1608_v51 = vpop.f32.mrb[26].mxu0 }
 0x4de   : > { %v1647_v52 = vadd.f32 %v1638_v30, %v1627_v48  ;;  %v1631_v53 = vmul.f32 %v1623_v27, %v1608_v51  ;;  %v1610_v59 = vpop.f32.mrb[27].mxu0 }
 0x4df   : > { %v1648_v60 = vadd.f32 %v1638_v30, %v1628_v50  ;;  %v1632_v62 = vmul.f32 %v1623_v27, %v1610_v59 }
 0x4e0   : > { %v1655_v63 = vmax.f32 %v1647_v52, 0.0  ;;  %v1651_v0 = vadd.f32 %v1643_v39, %v1631_v53 }
 0x4e1   : > { %v1656_v2 = vmax.f32 %v1648_v60, 0.0  ;;  %v1652_v3 = vadd.f32 %v1643_v39, %v1632_v62 }
 0x4e2   : > { %1663 = vst [vmem:[%s2523_s29 + $0x10] sm:$0xff] %v1655_v63  ;;  %v1659_v4 = vmax.f32 %v1651_v0, 0.0 }
 0x4e3   : > { %1664 = vst [vmem:[%s2523_s29 + $0x18] sm:$0xff] %v1656_v2  ;;  %v1660_v6 = vmax.f32 %v1652_v3, 0.0 }
 0x4e4   : > { %1667 = vst [vmem:[%s2523_s29 + $0x30] sm:$0x3] %v1659_v4 }
 0x4e5   : > { %1668 = vst [vmem:[%s2523_s29 + $0x38] sm:$0x3] %v1660_v6 }
 0x4e6 PF: > { %s24_s25 = sadd.s32 1, %s2056_s25  }
 0x4e7   : > { %p21_p4 = scmp.ge.s32.totalorder %s24_s25, 5  }
 0x4e9   :  { %23 = sbr.rel (!%p21_p4) target bundleno = 1 (0x1), region = 122 }

</bundles_post_ra>
